<compile_context>
chip_gen: v7x
topology: tpu7x:2x2x1
jax: 0.10.0
libtpu: 0.0.40
codegen_flags: <defaults>
</compile_context>

<pallas_src>
import functools

import jax
import jax.numpy as jnp
from jax.experimental import pallas as pl
from jax.experimental.pallas import tpu as pltpu

MXU_DTYPE = jnp.bfloat16       # MXU operand dtype; accumulation stays float32


# ----------------------------------------------------------------------------
# Pallas kernels (all process one image per grid step; refs are batch-squeezed)
# ----------------------------------------------------------------------------
def _conv_relu_kernel(x_ref, w_ref, b_ref, o_ref, *, kh, kw, relu):
    """3x3 (or kh x kw) valid conv + optional ReLU, shifted-dot accumulation.

    x_ref: (H, W, Cin) f32   w_ref: (kh*kw, Cin, Cout) bf16
    b_ref: (1, Cout) f32     o_ref: (Ho, Wo, Cout) f32
    """
    Ho, Wo, Cout = o_ref.shape

    @pl.loop(0, Ho)
    def _row(i):
        acc = jnp.zeros((Wo, Cout), jnp.float32) + b_ref[...]
        for di in range(kh):
            for dj in range(kw):
                xs = x_ref[i + di, dj:dj + Wo, :].astype(MXU_DTYPE)
                acc = acc + jnp.dot(xs, w_ref[di * kw + dj],
                                    preferred_element_type=jnp.float32)
        if relu:
            acc = jnp.maximum(acc, 0.0)
        o_ref[i] = acc.astype(o_ref.dtype)


def _last_conv_kernel(x_ref, w_ref, b_ref, wc_ref, bc_ref, o_ref, *, kh, kw, width):
    """Last main conv fused with ReLU, filters*masks gating and the composed
    (residual 1x1 conv  o  grouped 2x2/stride-2 deconv) per-pixel matmul.

    x_ref: (H, W, Cin) f32      w_ref: (kh*kw, Cin, 2*width) bf16
    b_ref: (1, 2*width) f32     wc_ref: (width, 12) bf16   bc_ref: (1, 12) f32
    o_ref: (Ho, Wo, 12) f32     (12 columns ordered (di, dj, rgb))
    """
    Ho, Wo, _ = o_ref.shape

    @pl.loop(0, Ho)
    def _row(i):
        acc = jnp.zeros((Wo, 2 * width), jnp.float32) + b_ref[...]
        for di in range(kh):
            for dj in range(kw):
                xs = x_ref[i + di, dj:dj + Wo, :].astype(MXU_DTYPE)
                acc = acc + jnp.dot(xs, w_ref[di * kw + dj],
                                    preferred_element_type=jnp.float32)
        acc = jnp.maximum(acc, 0.0)                      # relu{depth}
        gated = acc[:, :width] * acc[:, width:]          # filters * masks
        out = jnp.dot(gated.astype(MXU_DTYPE), wc_ref[...],
                      preferred_element_type=jnp.float32) + bc_ref[...]
        o_ref[i] = out.astype(o_ref.dtype)


def _fullres_kernel(s_ref, m_ref, u_ref, wa_ref, wb_ref, b1_ref,
                    w2_ref, b2_ref, o_ref, *, kh, kw):
    """Fullres processor: (cropped samples * Bayer mask  ||  upsampled) ->
    post_conv 3x3 -> ReLU -> output 1x1, all in one kernel.  The channel
    concat is avoided by accumulating two weight slabs into one accumulator.

    s_ref, u_ref: (Hp, Wp, 3) f32    m_ref: (Hp, Wp, 3) f32 (shared mask)
    wa_ref, wb_ref: (kh*kw, 3, width) bf16    b1_ref: (1, width) f32
    w2_ref: (width, 3) bf16    b2_ref: (1, 3) f32    o_ref: (Ho, Wo, 3) f32
    """
    Ho, Wo, _ = o_ref.shape
    width = b1_ref.shape[1]

    @pl.loop(0, Ho)
    def _row(i):
        acc = jnp.zeros((Wo, width), jnp.float32) + b1_ref[...]
        for di in range(kh):
            for dj in range(kw):
                mos = (s_ref[i + di, dj:dj + Wo, :] *
                       m_ref[i + di, dj:dj + Wo, :]).astype(MXU_DTYPE)
                acc = acc + jnp.dot(mos, wa_ref[di * kw + dj],
                                    preferred_element_type=jnp.float32)
                ups = u_ref[i + di, dj:dj + Wo, :].astype(MXU_DTYPE)
                acc = acc + jnp.dot(ups, wb_ref[di * kw + dj],
                                    preferred_element_type=jnp.float32)
        acc = jnp.maximum(acc, 0.0)                      # post_relu
        out = jnp.dot(acc.astype(MXU_DTYPE), w2_ref[...],
                      preferred_element_type=jnp.float32) + b2_ref[...]
        o_ref[i] = out.astype(o_ref.dtype)


# ----------------------------------------------------------------------------
# pallas_call wrappers (grid over batch, "parallel" for megacore sharding)
# ----------------------------------------------------------------------------
_PARALLEL = pltpu.CompilerParams(dimension_semantics=("parallel",))


def conv_layer(x, w, b, *, kh=3, kw=3, relu=True):
    N, H, W_, Cin = x.shape
    Cout = w.shape[-1]
    Ho, Wo = H - kh + 1, W_ - kw + 1
    return pl.pallas_call(
        functools.partial(_conv_relu_kernel, kh=kh, kw=kw, relu=relu),
        out_shape=jax.ShapeDtypeStruct((N, Ho, Wo, Cout), jnp.float32),
        grid=(N,),
        in_specs=[
            pl.BlockSpec((None, H, W_, Cin), lambda n: (n, 0, 0, 0)),
            pl.BlockSpec(w.shape, lambda n: (0, 0, 0)),
            pl.BlockSpec((1, Cout), lambda n: (0, 0)),
        ],
        out_specs=pl.BlockSpec((None, Ho, Wo, Cout), lambda n: (n, 0, 0, 0)),
        compiler_params=_PARALLEL,
    )(x, w, b.reshape(1, Cout).astype(jnp.float32))


def last_conv_layer(x, w, b, wc, bc, *, width, kh=3, kw=3):
    N, H, W_, Cin = x.shape
    Ho, Wo = H - kh + 1, W_ - kw + 1
    return pl.pallas_call(
        functools.partial(_last_conv_kernel, kh=kh, kw=kw, width=width),
        out_shape=jax.ShapeDtypeStruct((N, Ho, Wo, 12), jnp.float32),
        grid=(N,),
        in_specs=[
            pl.BlockSpec((None, H, W_, Cin), lambda n: (n, 0, 0, 0)),
            pl.BlockSpec(w.shape, lambda n: (0, 0, 0)),
            pl.BlockSpec((1, 2 * width), lambda n: (0, 0)),
            pl.BlockSpec(wc.shape, lambda n: (0, 0)),
            pl.BlockSpec((1, 12), lambda n: (0, 0)),
        ],
        out_specs=pl.BlockSpec((None, Ho, Wo, 12), lambda n: (n, 0, 0, 0)),
        compiler_params=_PARALLEL,
    )(x, w, b.reshape(1, -1).astype(jnp.float32), wc,
      bc.reshape(1, 12).astype(jnp.float32))


def fullres_layer(s, m, u, wa, wb, b1, w2, b2, *, kh=3, kw=3):
    N, Hp, Wp, C = s.shape
    width = b1.shape[0]
    Ho, Wo = Hp - kh + 1, Wp - kw + 1
    return pl.pallas_call(
        functools.partial(_fullres_kernel, kh=kh, kw=kw),
        out_shape=jax.ShapeDtypeStruct((N, Ho, Wo, 3), jnp.float32),
        grid=(N,),
        in_specs=[
            pl.BlockSpec((None, Hp, Wp, C), lambda n: (n, 0, 0, 0)),
            pl.BlockSpec((Hp, Wp, C), lambda n: (0, 0, 0)),       # shared mask
            pl.BlockSpec((None, Hp, Wp, C), lambda n: (n, 0, 0, 0)),
            pl.BlockSpec(wa.shape, lambda n: (0, 0, 0)),
            pl.BlockSpec(wb.shape, lambda n: (0, 0, 0)),
            pl.BlockSpec((1, width), lambda n: (0, 0)),
            pl.BlockSpec(w2.shape, lambda n: (0, 0)),
            pl.BlockSpec((1, 3), lambda n: (0, 0)),
        ],
        out_specs=pl.BlockSpec((None, Ho, Wo, 3), lambda n: (n, 0, 0, 0)),
        compiler_params=_PARALLEL,
    )(s, m, u, wa, wb, b1.reshape(1, width).astype(jnp.float32),
      w2, b2.reshape(1, 3).astype(jnp.float32))


# ----------------------------------------------------------------------------
# Parameter-layout helpers (pure glue, tiny constants)
# ----------------------------------------------------------------------------
def pack_conv_weight(w):
    """(Cout, Cin, kh, kw) PyTorch conv weight -> (kh*kw, Cin, Cout) bf16,
    tap index = di*kw + dj (matches the in-kernel slab indexing)."""
    Cout, Cin, kh, kw = w.shape
    return jnp.transpose(w, (2, 3, 1, 0)).reshape(kh * kw, Cin, Cout).astype(MXU_DTYPE)


def bayer_mosaic_mask(H, W):
    """GRBG Bayer CFA mask, shape (H, W, 3) of {0,1}:
    R at (even row, odd col), G at matching parities, B at (odd row, even col)."""
    rp = (jnp.arange(H) % 2)[:, None]
    cp = (jnp.arange(W) % 2)[None, :]
    red = (rp == 0) & (cp == 1)
    green = rp == cp
    blue = (rp == 1) & (cp == 0)
    return jnp.stack([red, green, blue], axis=-1).astype(jnp.float32)


def compose_residual_upsampler(w_res, b_res, w_up, b_up):
    """Compose the residual 1x1 conv (width->12) with the grouped
    ConvTranspose2d(12, 3, 2, stride=2, groups=3).  kernel == stride => no
    overlap, so the deconv is a per-pixel linear map into 12 packed outputs
    with column order (di, dj, rgb)."""
    width = w_res.shape[1]
    Wr = w_res.reshape(12, width)                         # residual = Wr @ f + b_res
    gid = jnp.arange(12) // 4                             # deconv group per channel
    onehot = jax.nn.one_hot(gid, 3, dtype=jnp.float32)    # (12, 3)
    wu = w_up.reshape(12, 4)                              # (c, di*2+dj)
    M = (wu[:, :, None] * onehot[:, None, :]).reshape(12, 12)   # col = (di*2+dj)*3+g
    Wc = Wr.T @ M                                         # (width, 12)
    bc = b_res @ M + jnp.tile(b_up, 4)                    # (12,)
    return Wc, bc


# ----------------------------------------------------------------------------
# Parameters (deterministic, kaiming-normal fan_out like init_params)
# ----------------------------------------------------------------------------
def init_params(key, depth, width):
    keys = iter(jax.random.split(key, 64))

    def conv_w(k, cout, cin, kh, kw):
        fan_out = cout * kh * kw
        std = (2.0 / fan_out) ** 0.5
        return jax.random.normal(k, (cout, cin, kh, kw), jnp.float32) * std

    params = {}
    params["pack_mosaic"] = (conv_w(next(keys), 4, 3, 2, 2), jnp.zeros((4,), jnp.float32))
    convs = []
    for i in range(depth):
        n_in = 4 if i == 0 else width
        n_out = 2 * width if i == depth - 1 else width
        convs.append((conv_w(next(keys), n_out, n_in, 3, 3), jnp.zeros((n_out,), jnp.float32)))
    params["convs"] = convs
    params["residual"] = (conv_w(next(keys), 12, width, 1, 1), jnp.zeros((12,), jnp.float32))
    # ConvTranspose2d(12, 3, 2, stride=2, groups=3): weight (12, 1, 2, 2), bias (3,)
    params["upsampler"] = (
        jax.random.normal(next(keys), (12, 1, 2, 2), jnp.float32) * 0.1,
        jnp.zeros((3,), jnp.float32),
    )
    params["post_conv"] = (conv_w(next(keys), width, 6, 3, 3), jnp.zeros((width,), jnp.float32))
    params["output"] = (conv_w(next(keys), 3, width, 1, 1), jnp.zeros((3,), jnp.float32))
    return params


# ----------------------------------------------------------------------------
# BayerNetwork.forward
# ----------------------------------------------------------------------------
def bayer_network_forward(params, samples, no_use=None, *, depth, width):
    del no_use
    assert depth >= 1
    N, C, H, W = samples.shape
    assert C == 3 and H % 2 == 0 and W % 2 == 0
    x = jnp.transpose(samples, (0, 2, 3, 1))              # NHWC once at the boundary

    mask_full = bayer_mosaic_mask(H, W)                   # (H, W, 3)
    mask_2x2 = bayer_mosaic_mask(2, 2)                    # one Bayer period

    # --- pack_mosaic folded into conv1 -------------------------------------
    # mosaic = samples * mask ; pack = Conv2d(3, 4, 2, stride=2)(mosaic).
    # The mask is 2-periodic and the pack conv has kernel == stride == 2, so
    # every tap sees a constant mask value -> fold it into the pack weights.
    # pack has no nonlinearity, so it composes linearly with conv1.
    wp, bp = params["pack_mosaic"]                         # (4,3,2,2), (4,)
    wp_masked = (jnp.transpose(wp, (0, 2, 3, 1)) * mask_2x2[None]).reshape(4, 12)
    w1, b1 = params["convs"][0]                            # (n_out0, 4, 3, 3)
    w1c = jnp.einsum("omij,mk->okij", w1, wp_masked)       # composed over 12 s2d chans
    b1c = b1 + jnp.einsum("omij,m->o", w1, bp)

    # space-to-depth of the raw input: the masked pack conv + conv1 become a
    # single stride-1 3x3 conv over this 12-channel half-resolution tensor.
    s2d = x.reshape(N, H // 2, 2, W // 2, 2, 3)
    s2d = jnp.transpose(s2d, (0, 1, 3, 2, 4, 5)).reshape(N, H // 2, W // 2, 12)

    # --- residual 1x1 conv composed with the grouped deconv ----------------
    wr, br = params["residual"]
    wu, bu = params["upsampler"]
    wc, bc = compose_residual_upsampler(wr, br, wu, bu)

    # --- main processor -----------------------------------------------------
    main_w = [(w1c, b1c)] + list(params["convs"][1:])
    h = s2d
    for i in range(depth - 1):
        wi, bi = main_w[i]
        h = conv_layer(h, pack_conv_weight(wi), bi, relu=True)
    w_last, b_last = main_w[depth - 1]
    packed12 = last_conv_layer(h, pack_conv_weight(w_last), b_last,
                               wc.astype(MXU_DTYPE), bc, width=width)

    # pixel-shuffle the packed (di, dj, rgb) columns -> upsampled NHWC image
    Hc, Wc_ = packed12.shape[1], packed12.shape[2]
    up = packed12.reshape(N, Hc, Wc_, 2, 2, 3)
    up = jnp.transpose(up, (0, 1, 3, 2, 4, 5)).reshape(N, 2 * Hc, 2 * Wc_, 3)

    # --- fullres processor (concat avoided; mask applied in-kernel) --------
    Hu, Wu = 2 * Hc, 2 * Wc_
    ch, cw = (H - Hu) // 2, (W - Wu) // 2                  # centered crop_like
    s_crop = x[:, ch:ch + Hu, cw:cw + Wu, :]
    m_crop = mask_full[ch:ch + Hu, cw:cw + Wu, :]
    wpost, bpost = params["post_conv"]                     # (width, 6, 3, 3)
    wa = pack_conv_weight(wpost[:, :3])                    # cropped-mosaic slab
    wb = pack_conv_weight(wpost[:, 3:])                    # upsampled slab
    wout, bout = params["output"]                          # (3, width, 1, 1)
    w2 = wout.reshape(3, width).T.astype(MXU_DTYPE)        # (width, 3)

    out = fullres_layer(s_crop, m_crop, up, wa, wb, bpost, w2, bout)
    return jnp.transpose(out, (0, 3, 1, 2))                # back to NCHW


if __name__ == "__main__":
    depth, width = 2, 16          # args.depth, args.width
    N, H, W = 2, 24, 24
    key = jax.random.PRNGKey(0)
    kx, kp = jax.random.split(key)
    samples = jax.random.normal(kx, (N, 3, H, W), jnp.float32)
    params = init_params(kp, depth, width)

    fwd = jax.jit(functools.partial(bayer_network_forward, depth=depth, width=width))
    out = fwd(params, samples)
    jax.block_until_ready(out)

    expect = (N, 3, H - 4 * depth - 2, W - 4 * depth - 2)   # (2, 3, 14, 14)
    assert out.shape == expect, (out.shape, expect)
    assert out.dtype == jnp.float32
    assert bool(jnp.all(jnp.isfinite(out)))
    print("KERNEL_OK")
</pallas_src>

<mosaic_0001>
module attributes {stable_mosaic.version = 11 : i64} {
  func.func @_conv_relu_kernel(%arg0: i32, %arg1: memref<1x12x12x12xf32, #tpu.memory_space<vmem>>, %arg2: memref<9x12x16xbf16, #tpu.memory_space<vmem>>, %arg3: memref<1x16xf32, #tpu.memory_space<vmem>>, %arg4: memref<1x10x10x16xf32, #tpu.memory_space<vmem>>) attributes {dimension_semantics = [#tpu.dimension_semantics<parallel>], iteration_bounds = array<i64: 2>, scalar_prefetch = 0 : i64, scratch_operands = 0 : i64, tpu.core_type = #tpu.core_type<tc>, window_params = [{transform_indices = @transform_0, window_bounds = array<i64: 1, 12, 12, 12>}, {pipeline_mode = #tpu.pipeline_mode<synchronous>, transform_indices = @transform_1, window_bounds = array<i64: 9, 12, 16>}, {pipeline_mode = #tpu.pipeline_mode<synchronous>, transform_indices = @transform_2, window_bounds = array<i64: 1, 16>}, {transform_indices = @transform_3, window_bounds = array<i64: 1, 10, 10, 16>}]} {
    %c0_i32 = arith.constant 0 : i32
    %c10_i32 = arith.constant 10 : i32
    %0 = arith.addi %c0_i32, %c10_i32 : i32
    %c1_i32 = arith.constant 1 : i32
    scf.for %arg5 = %c0_i32 to %0 step %c1_i32  : i32 {
      %c1_i32_1 = arith.constant 1 : i32
      %1 = arith.muli %arg5, %c1_i32_1 : i32
      %c0_i32_2 = arith.constant 0 : i32
      %2 = arith.addi %c0_i32_2, %1 : i32
      %cst = arith.constant 0.000000e+00 : f32
      %3 = vector.broadcast %cst : f32 to vector<10x16xf32>
      %c0 = arith.constant 0 : index
      %c0_3 = arith.constant 0 : index
      %4 = vector.load %arg3[%c0, %c0_3] : memref<1x16xf32, #tpu.memory_space<vmem>>, vector<1x16xf32>
      %5 = vector.broadcast %4 : vector<1x16xf32> to vector<10x16xf32>
      %6 = arith.addf %3, %5 : vector<10x16xf32>
      %c0_i32_4 = arith.constant 0 : i32
      %7 = arith.addi %2, %c0_i32_4 : i32
      %c0_5 = arith.constant 0 : index
      %8 = arith.index_cast %7 : i32 to index
      %c0_6 = arith.constant 0 : index
      %c0_7 = arith.constant 0 : index
      %9 = vector.load %arg1[%c0_5, %8, %c0_6, %c0_7] : memref<1x12x12x12xf32, #tpu.memory_space<vmem>>, vector<1x1x10x12xf32>
      %10 = vector.shape_cast %9 : vector<1x1x10x12xf32> to vector<10x12xf32>
      %11 = arith.truncf %10 : vector<10x12xf32> to vector<10x12xbf16>
      %c0_8 = arith.constant 0 : index
      %c0_9 = arith.constant 0 : index
      %c0_10 = arith.constant 0 : index
      %12 = vector.load %arg2[%c0_8, %c0_9, %c0_10] : memref<9x12x16xbf16, #tpu.memory_space<vmem>>, vector<1x12x16xbf16>
      %13 = vector.shape_cast %12 : vector<1x12x16xbf16> to vector<12x16xbf16>
      %cst_11 = arith.constant dense<0.000000e+00> : vector<10x16xf32>
      %14 = tpu.matmul %11, %13, %cst_11 {dimension_numbers = #tpu.dot_dimension_numbers<[1], [0], [0], [1], [0, 0, 1, 1], [], []>} : vector<10x12xbf16>, vector<12x16xbf16>, vector<10x16xf32> -> vector<10x16xf32>
      %15 = arith.addf %6, %14 : vector<10x16xf32>
      %c0_i32_12 = arith.constant 0 : i32
      %16 = arith.addi %2, %c0_i32_12 : i32
      %c0_13 = arith.constant 0 : index
      %17 = arith.index_cast %16 : i32 to index
      %c1 = arith.constant 1 : index
      %c0_14 = arith.constant 0 : index
      %18 = vector.load %arg1[%c0_13, %17, %c1, %c0_14] : memref<1x12x12x12xf32, #tpu.memory_space<vmem>>, vector<1x1x10x12xf32>
      %19 = vector.shape_cast %18 : vector<1x1x10x12xf32> to vector<10x12xf32>
      %20 = arith.truncf %19 : vector<10x12xf32> to vector<10x12xbf16>
      %c1_15 = arith.constant 1 : index
      %c0_16 = arith.constant 0 : index
      %c0_17 = arith.constant 0 : index
      %21 = vector.load %arg2[%c1_15, %c0_16, %c0_17] : memref<9x12x16xbf16, #tpu.memory_space<vmem>>, vector<1x12x16xbf16>
      %22 = vector.shape_cast %21 : vector<1x12x16xbf16> to vector<12x16xbf16>
      %cst_18 = arith.constant dense<0.000000e+00> : vector<10x16xf32>
      %23 = tpu.matmul %20, %22, %cst_18 {dimension_numbers = #tpu.dot_dimension_numbers<[1], [0], [0], [1], [0, 0, 1, 1], [], []>} : vector<10x12xbf16>, vector<12x16xbf16>, vector<10x16xf32> -> vector<10x16xf32>
      %24 = arith.addf %15, %23 : vector<10x16xf32>
      %c0_i32_19 = arith.constant 0 : i32
      %25 = arith.addi %2, %c0_i32_19 : i32
      %c0_20 = arith.constant 0 : index
      %26 = arith.index_cast %25 : i32 to index
      %c2 = arith.constant 2 : index
      %c0_21 = arith.constant 0 : index
      %27 = vector.load %arg1[%c0_20, %26, %c2, %c0_21] : memref<1x12x12x12xf32, #tpu.memory_space<vmem>>, vector<1x1x10x12xf32>
      %28 = vector.shape_cast %27 : vector<1x1x10x12xf32> to vector<10x12xf32>
      %29 = arith.truncf %28 : vector<10x12xf32> to vector<10x12xbf16>
      %c2_22 = arith.constant 2 : index
      %c0_23 = arith.constant 0 : index
      %c0_24 = arith.constant 0 : index
      %30 = vector.load %arg2[%c2_22, %c0_23, %c0_24] : memref<9x12x16xbf16, #tpu.memory_space<vmem>>, vector<1x12x16xbf16>
      %31 = vector.shape_cast %30 : vector<1x12x16xbf16> to vector<12x16xbf16>
      %cst_25 = arith.constant dense<0.000000e+00> : vector<10x16xf32>
      %32 = tpu.matmul %29, %31, %cst_25 {dimension_numbers = #tpu.dot_dimension_numbers<[1], [0], [0], [1], [0, 0, 1, 1], [], []>} : vector<10x12xbf16>, vector<12x16xbf16>, vector<10x16xf32> -> vector<10x16xf32>
      %33 = arith.addf %24, %32 : vector<10x16xf32>
      %c1_i32_26 = arith.constant 1 : i32
      %34 = arith.addi %2, %c1_i32_26 : i32
      %c0_27 = arith.constant 0 : index
      %35 = arith.index_cast %34 : i32 to index
      %c0_28 = arith.constant 0 : index
      %c0_29 = arith.constant 0 : index
      %36 = vector.load %arg1[%c0_27, %35, %c0_28, %c0_29] : memref<1x12x12x12xf32, #tpu.memory_space<vmem>>, vector<1x1x10x12xf32>
      %37 = vector.shape_cast %36 : vector<1x1x10x12xf32> to vector<10x12xf32>
      %38 = arith.truncf %37 : vector<10x12xf32> to vector<10x12xbf16>
      %c3 = arith.constant 3 : index
      %c0_30 = arith.constant 0 : index
      %c0_31 = arith.constant 0 : index
      %39 = vector.load %arg2[%c3, %c0_30, %c0_31] : memref<9x12x16xbf16, #tpu.memory_space<vmem>>, vector<1x12x16xbf16>
      %40 = vector.shape_cast %39 : vector<1x12x16xbf16> to vector<12x16xbf16>
      %cst_32 = arith.constant dense<0.000000e+00> : vector<10x16xf32>
      %41 = tpu.matmul %38, %40, %cst_32 {dimension_numbers = #tpu.dot_dimension_numbers<[1], [0], [0], [1], [0, 0, 1, 1], [], []>} : vector<10x12xbf16>, vector<12x16xbf16>, vector<10x16xf32> -> vector<10x16xf32>
      %42 = arith.addf %33, %41 : vector<10x16xf32>
      %c1_i32_33 = arith.constant 1 : i32
      %43 = arith.addi %2, %c1_i32_33 : i32
      %c0_34 = arith.constant 0 : index
      %44 = arith.index_cast %43 : i32 to index
      %c1_35 = arith.constant 1 : index
      %c0_36 = arith.constant 0 : index
      %45 = vector.load %arg1[%c0_34, %44, %c1_35, %c0_36] : memref<1x12x12x12xf32, #tpu.memory_space<vmem>>, vector<1x1x10x12xf32>
      %46 = vector.shape_cast %45 : vector<1x1x10x12xf32> to vector<10x12xf32>
      %47 = arith.truncf %46 : vector<10x12xf32> to vector<10x12xbf16>
      %c4 = arith.constant 4 : index
      %c0_37 = arith.constant 0 : index
      %c0_38 = arith.constant 0 : index
      %48 = vector.load %arg2[%c4, %c0_37, %c0_38] : memref<9x12x16xbf16, #tpu.memory_space<vmem>>, vector<1x12x16xbf16>
      %49 = vector.shape_cast %48 : vector<1x12x16xbf16> to vector<12x16xbf16>
      %cst_39 = arith.constant dense<0.000000e+00> : vector<10x16xf32>
      %50 = tpu.matmul %47, %49, %cst_39 {dimension_numbers = #tpu.dot_dimension_numbers<[1], [0], [0], [1], [0, 0, 1, 1], [], []>} : vector<10x12xbf16>, vector<12x16xbf16>, vector<10x16xf32> -> vector<10x16xf32>
      %51 = arith.addf %42, %50 : vector<10x16xf32>
      %c1_i32_40 = arith.constant 1 : i32
      %52 = arith.addi %2, %c1_i32_40 : i32
      %c0_41 = arith.constant 0 : index
      %53 = arith.index_cast %52 : i32 to index
      %c2_42 = arith.constant 2 : index
      %c0_43 = arith.constant 0 : index
      %54 = vector.load %arg1[%c0_41, %53, %c2_42, %c0_43] : memref<1x12x12x12xf32, #tpu.memory_space<vmem>>, vector<1x1x10x12xf32>
      %55 = vector.shape_cast %54 : vector<1x1x10x12xf32> to vector<10x12xf32>
      %56 = arith.truncf %55 : vector<10x12xf32> to vector<10x12xbf16>
      %c5 = arith.constant 5 : index
      %c0_44 = arith.constant 0 : index
      %c0_45 = arith.constant 0 : index
      %57 = vector.load %arg2[%c5, %c0_44, %c0_45] : memref<9x12x16xbf16, #tpu.memory_space<vmem>>, vector<1x12x16xbf16>
      %58 = vector.shape_cast %57 : vector<1x12x16xbf16> to vector<12x16xbf16>
      %cst_46 = arith.constant dense<0.000000e+00> : vector<10x16xf32>
      %59 = tpu.matmul %56, %58, %cst_46 {dimension_numbers = #tpu.dot_dimension_numbers<[1], [0], [0], [1], [0, 0, 1, 1], [], []>} : vector<10x12xbf16>, vector<12x16xbf16>, vector<10x16xf32> -> vector<10x16xf32>
      %60 = arith.addf %51, %59 : vector<10x16xf32>
      %c2_i32 = arith.constant 2 : i32
      %61 = arith.addi %2, %c2_i32 : i32
      %c0_47 = arith.constant 0 : index
      %62 = arith.index_cast %61 : i32 to index
      %c0_48 = arith.constant 0 : index
      %c0_49 = arith.constant 0 : index
      %63 = vector.load %arg1[%c0_47, %62, %c0_48, %c0_49] : memref<1x12x12x12xf32, #tpu.memory_space<vmem>>, vector<1x1x10x12xf32>
      %64 = vector.shape_cast %63 : vector<1x1x10x12xf32> to vector<10x12xf32>
      %65 = arith.truncf %64 : vector<10x12xf32> to vector<10x12xbf16>
      %c6 = arith.constant 6 : index
      %c0_50 = arith.constant 0 : index
      %c0_51 = arith.constant 0 : index
      %66 = vector.load %arg2[%c6, %c0_50, %c0_51] : memref<9x12x16xbf16, #tpu.memory_space<vmem>>, vector<1x12x16xbf16>
      %67 = vector.shape_cast %66 : vector<1x12x16xbf16> to vector<12x16xbf16>
      %cst_52 = arith.constant dense<0.000000e+00> : vector<10x16xf32>
      %68 = tpu.matmul %65, %67, %cst_52 {dimension_numbers = #tpu.dot_dimension_numbers<[1], [0], [0], [1], [0, 0, 1, 1], [], []>} : vector<10x12xbf16>, vector<12x16xbf16>, vector<10x16xf32> -> vector<10x16xf32>
      %69 = arith.addf %60, %68 : vector<10x16xf32>
      %c2_i32_53 = arith.constant 2 : i32
      %70 = arith.addi %2, %c2_i32_53 : i32
      %c0_54 = arith.constant 0 : index
      %71 = arith.index_cast %70 : i32 to index
      %c1_55 = arith.constant 1 : index
      %c0_56 = arith.constant 0 : index
      %72 = vector.load %arg1[%c0_54, %71, %c1_55, %c0_56] : memref<1x12x12x12xf32, #tpu.memory_space<vmem>>, vector<1x1x10x12xf32>
      %73 = vector.shape_cast %72 : vector<1x1x10x12xf32> to vector<10x12xf32>
      %74 = arith.truncf %73 : vector<10x12xf32> to vector<10x12xbf16>
      %c7 = arith.constant 7 : index
      %c0_57 = arith.constant 0 : index
      %c0_58 = arith.constant 0 : index
      %75 = vector.load %arg2[%c7, %c0_57, %c0_58] : memref<9x12x16xbf16, #tpu.memory_space<vmem>>, vector<1x12x16xbf16>
      %76 = vector.shape_cast %75 : vector<1x12x16xbf16> to vector<12x16xbf16>
      %cst_59 = arith.constant dense<0.000000e+00> : vector<10x16xf32>
      %77 = tpu.matmul %74, %76, %cst_59 {dimension_numbers = #tpu.dot_dimension_numbers<[1], [0], [0], [1], [0, 0, 1, 1], [], []>} : vector<10x12xbf16>, vector<12x16xbf16>, vector<10x16xf32> -> vector<10x16xf32>
      %78 = arith.addf %69, %77 : vector<10x16xf32>
      %c2_i32_60 = arith.constant 2 : i32
      %79 = arith.addi %2, %c2_i32_60 : i32
      %c0_61 = arith.constant 0 : index
      %80 = arith.index_cast %79 : i32 to index
      %c2_62 = arith.constant 2 : index
      %c0_63 = arith.constant 0 : index
      %81 = vector.load %arg1[%c0_61, %80, %c2_62, %c0_63] : memref<1x12x12x12xf32, #tpu.memory_space<vmem>>, vector<1x1x10x12xf32>
      %82 = vector.shape_cast %81 : vector<1x1x10x12xf32> to vector<10x12xf32>
      %83 = arith.truncf %82 : vector<10x12xf32> to vector<10x12xbf16>
      %c8 = arith.constant 8 : index
      %c0_64 = arith.constant 0 : index
      %c0_65 = arith.constant 0 : index
      %84 = vector.load %arg2[%c8, %c0_64, %c0_65] : memref<9x12x16xbf16, #tpu.memory_space<vmem>>, vector<1x12x16xbf16>
      %85 = vector.shape_cast %84 : vector<1x12x16xbf16> to vector<12x16xbf16>
      %cst_66 = arith.constant dense<0.000000e+00> : vector<10x16xf32>
      %86 = tpu.matmul %83, %85, %cst_66 {dimension_numbers = #tpu.dot_dimension_numbers<[1], [0], [0], [1], [0, 0, 1, 1], [], []>} : vector<10x12xbf16>, vector<12x16xbf16>, vector<10x16xf32> -> vector<10x16xf32>
      %87 = arith.addf %78, %86 : vector<10x16xf32>
      %cst_67 = arith.constant 0.000000e+00 : f32
      %88 = vector.broadcast %cst_67 : f32 to vector<10x16xf32>
      %89 = arith.maximumf %87, %88 : vector<10x16xf32>
      %c0_68 = arith.constant 0 : index
      %90 = arith.index_cast %2 : i32 to index
      %c0_69 = arith.constant 0 : index
      %c0_70 = arith.constant 0 : index
      %91 = vector.load %arg4[%c0_68, %90, %c0_69, %c0_70] : memref<1x10x10x16xf32, #tpu.memory_space<vmem>>, vector<1x1x10x16xf32>
      %92 = vector.shape_cast %91 : vector<1x1x10x16xf32> to vector<10x16xf32>
      %93 = vector.shape_cast %89 : vector<10x16xf32> to vector<1x1x10x16xf32>
      tpu.vector_store %arg4[%c0_68, %90, %c0_69, %c0_70], %93 {strides = array<i32>} : memref<1x10x10x16xf32, #tpu.memory_space<vmem>>, vector<1x1x10x16xf32>,
    }
    %c10_i32_0 = arith.constant 10 : i32
    return
  }
  func.func @transform_0(%arg0: i32) -> (i32, i32, i32, i32) {
    %c0_i32 = arith.constant 0 : i32
    %c0_i32_0 = arith.constant 0 : i32
    %c0_i32_1 = arith.constant 0 : i32
    %c0_i32_2 = arith.constant 0 : i32
    return %arg0, %c0_i32, %c0_i32_0, %c0_i32_1 : i32, i32, i32, i32
  }
  func.func @transform_1(%arg0: i32) -> (i32, i32, i32) {
    %c0_i32 = arith.constant 0 : i32
    %c0_i32_0 = arith.constant 0 : i32
    %c0_i32_1 = arith.constant 0 : i32
    %c0_i32_2 = arith.constant 0 : i32
    return %c0_i32, %c0_i32_0, %c0_i32_1 : i32, i32, i32
  }
  func.func @transform_2(%arg0: i32) -> (i32, i32) {
    %c0_i32 = arith.constant 0 : i32
    %c0_i32_0 = arith.constant 0 : i32
    %c0_i32_1 = arith.constant 0 : i32
    return %c0_i32, %c0_i32_0 : i32, i32
  }
  func.func @transform_3(%arg0: i32) -> (i32, i32, i32, i32) {
    %c0_i32 = arith.constant 0 : i32
    %c0_i32_0 = arith.constant 0 : i32
    %c0_i32_1 = arith.constant 0 : i32
    %c0_i32_2 = arith.constant 0 : i32
    return %arg0, %c0_i32, %c0_i32_0, %c0_i32_1 : i32, i32, i32, i32
  }
}

module attributes {stable_mosaic.version = 11 : i64} {
  func.func @_last_conv_kernel(%arg0: i32, %arg1: memref<1x10x10x16xf32, #tpu.memory_space<vmem>>, %arg2: memref<9x16x32xbf16, #tpu.memory_space<vmem>>, %arg3: memref<1x32xf32, #tpu.memory_space<vmem>>, %arg4: memref<16x12xbf16, #tpu.memory_space<vmem>>, %arg5: memref<1x12xf32, #tpu.memory_space<vmem>>, %arg6: memref<1x8x8x12xf32, #tpu.memory_space<vmem>>) attributes {dimension_semantics = [#tpu.dimension_semantics<parallel>], iteration_bounds = array<i64: 2>, scalar_prefetch = 0 : i64, scratch_operands = 0 : i64, tpu.core_type = #tpu.core_type<tc>, window_params = [{transform_indices = @transform_0, window_bounds = array<i64: 1, 10, 10, 16>}, {pipeline_mode = #tpu.pipeline_mode<synchronous>, transform_indices = @transform_1, window_bounds = array<i64: 9, 16, 32>}, {pipeline_mode = #tpu.pipeline_mode<synchronous>, transform_indices = @transform_2, window_bounds = array<i64: 1, 32>}, {pipeline_mode = #tpu.pipeline_mode<synchronous>, transform_indices = @transform_3, window_bounds = array<i64: 16, 12>}, {pipeline_mode = #tpu.pipeline_mode<synchronous>, transform_indices = @transform_4, window_bounds = array<i64: 1, 12>}, {transform_indices = @transform_5, window_bounds = array<i64: 1, 8, 8, 12>}]} {
    %c0_i32 = arith.constant 0 : i32
    %c8_i32 = arith.constant 8 : i32
    %0 = arith.addi %c0_i32, %c8_i32 : i32
    %c1_i32 = arith.constant 1 : i32
    scf.for %arg7 = %c0_i32 to %0 step %c1_i32  : i32 {
      %c1_i32_1 = arith.constant 1 : i32
      %1 = arith.muli %arg7, %c1_i32_1 : i32
      %c0_i32_2 = arith.constant 0 : i32
      %2 = arith.addi %c0_i32_2, %1 : i32
      %cst = arith.constant 0.000000e+00 : f32
      %3 = vector.broadcast %cst : f32 to vector<8x32xf32>
      %c0 = arith.constant 0 : index
      %c0_3 = arith.constant 0 : index
      %4 = vector.load %arg3[%c0, %c0_3] : memref<1x32xf32, #tpu.memory_space<vmem>>, vector<1x32xf32>
      %5 = vector.broadcast %4 : vector<1x32xf32> to vector<8x32xf32>
      %6 = arith.addf %3, %5 : vector<8x32xf32>
      %c0_i32_4 = arith.constant 0 : i32
      %7 = arith.addi %2, %c0_i32_4 : i32
      %c0_5 = arith.constant 0 : index
      %8 = arith.index_cast %7 : i32 to index
      %c0_6 = arith.constant 0 : index
      %c0_7 = arith.constant 0 : index
      %9 = vector.load %arg1[%c0_5, %8, %c0_6, %c0_7] : memref<1x10x10x16xf32, #tpu.memory_space<vmem>>, vector<1x1x8x16xf32>
      %10 = vector.shape_cast %9 : vector<1x1x8x16xf32> to vector<8x16xf32>
      %11 = arith.truncf %10 : vector<8x16xf32> to vector<8x16xbf16>
      %c0_8 = arith.constant 0 : index
      %c0_9 = arith.constant 0 : index
      %c0_10 = arith.constant 0 : index
      %12 = vector.load %arg2[%c0_8, %c0_9, %c0_10] : memref<9x16x32xbf16, #tpu.memory_space<vmem>>, vector<1x16x32xbf16>
      %13 = vector.shape_cast %12 : vector<1x16x32xbf16> to vector<16x32xbf16>
      %cst_11 = arith.constant dense<0.000000e+00> : vector<8x32xf32>
      %14 = tpu.matmul %11, %13, %cst_11 {dimension_numbers = #tpu.dot_dimension_numbers<[1], [0], [0], [1], [0, 0, 1, 1], [], []>} : vector<8x16xbf16>, vector<16x32xbf16>, vector<8x32xf32> -> vector<8x32xf32>
      %15 = arith.addf %6, %14 : vector<8x32xf32>
      %c0_i32_12 = arith.constant 0 : i32
      %16 = arith.addi %2, %c0_i32_12 : i32
      %c0_13 = arith.constant 0 : index
      %17 = arith.index_cast %16 : i32 to index
      %c1 = arith.constant 1 : index
      %c0_14 = arith.constant 0 : index
      %18 = vector.load %arg1[%c0_13, %17, %c1, %c0_14] : memref<1x10x10x16xf32, #tpu.memory_space<vmem>>, vector<1x1x8x16xf32>
      %19 = vector.shape_cast %18 : vector<1x1x8x16xf32> to vector<8x16xf32>
      %20 = arith.truncf %19 : vector<8x16xf32> to vector<8x16xbf16>
      %c1_15 = arith.constant 1 : index
      %c0_16 = arith.constant 0 : index
      %c0_17 = arith.constant 0 : index
      %21 = vector.load %arg2[%c1_15, %c0_16, %c0_17] : memref<9x16x32xbf16, #tpu.memory_space<vmem>>, vector<1x16x32xbf16>
      %22 = vector.shape_cast %21 : vector<1x16x32xbf16> to vector<16x32xbf16>
      %cst_18 = arith.constant dense<0.000000e+00> : vector<8x32xf32>
      %23 = tpu.matmul %20, %22, %cst_18 {dimension_numbers = #tpu.dot_dimension_numbers<[1], [0], [0], [1], [0, 0, 1, 1], [], []>} : vector<8x16xbf16>, vector<16x32xbf16>, vector<8x32xf32> -> vector<8x32xf32>
      %24 = arith.addf %15, %23 : vector<8x32xf32>
      %c0_i32_19 = arith.constant 0 : i32
      %25 = arith.addi %2, %c0_i32_19 : i32
      %c0_20 = arith.constant 0 : index
      %26 = arith.index_cast %25 : i32 to index
      %c2 = arith.constant 2 : index
      %c0_21 = arith.constant 0 : index
      %27 = vector.load %arg1[%c0_20, %26, %c2, %c0_21] : memref<1x10x10x16xf32, #tpu.memory_space<vmem>>, vector<1x1x8x16xf32>
      %28 = vector.shape_cast %27 : vector<1x1x8x16xf32> to vector<8x16xf32>
      %29 = arith.truncf %28 : vector<8x16xf32> to vector<8x16xbf16>
      %c2_22 = arith.constant 2 : index
      %c0_23 = arith.constant 0 : index
      %c0_24 = arith.constant 0 : index
      %30 = vector.load %arg2[%c2_22, %c0_23, %c0_24] : memref<9x16x32xbf16, #tpu.memory_space<vmem>>, vector<1x16x32xbf16>
      %31 = vector.shape_cast %30 : vector<1x16x32xbf16> to vector<16x32xbf16>
      %cst_25 = arith.constant dense<0.000000e+00> : vector<8x32xf32>
      %32 = tpu.matmul %29, %31, %cst_25 {dimension_numbers = #tpu.dot_dimension_numbers<[1], [0], [0], [1], [0, 0, 1, 1], [], []>} : vector<8x16xbf16>, vector<16x32xbf16>, vector<8x32xf32> -> vector<8x32xf32>
      %33 = arith.addf %24, %32 : vector<8x32xf32>
      %c1_i32_26 = arith.constant 1 : i32
      %34 = arith.addi %2, %c1_i32_26 : i32
      %c0_27 = arith.constant 0 : index
      %35 = arith.index_cast %34 : i32 to index
      %c0_28 = arith.constant 0 : index
      %c0_29 = arith.constant 0 : index
      %36 = vector.load %arg1[%c0_27, %35, %c0_28, %c0_29] : memref<1x10x10x16xf32, #tpu.memory_space<vmem>>, vector<1x1x8x16xf32>
      %37 = vector.shape_cast %36 : vector<1x1x8x16xf32> to vector<8x16xf32>
      %38 = arith.truncf %37 : vector<8x16xf32> to vector<8x16xbf16>
      %c3 = arith.constant 3 : index
      %c0_30 = arith.constant 0 : index
      %c0_31 = arith.constant 0 : index
      %39 = vector.load %arg2[%c3, %c0_30, %c0_31] : memref<9x16x32xbf16, #tpu.memory_space<vmem>>, vector<1x16x32xbf16>
      %40 = vector.shape_cast %39 : vector<1x16x32xbf16> to vector<16x32xbf16>
      %cst_32 = arith.constant dense<0.000000e+00> : vector<8x32xf32>
      %41 = tpu.matmul %38, %40, %cst_32 {dimension_numbers = #tpu.dot_dimension_numbers<[1], [0], [0], [1], [0, 0, 1, 1], [], []>} : vector<8x16xbf16>, vector<16x32xbf16>, vector<8x32xf32> -> vector<8x32xf32>
      %42 = arith.addf %33, %41 : vector<8x32xf32>
      %c1_i32_33 = arith.constant 1 : i32
      %43 = arith.addi %2, %c1_i32_33 : i32
      %c0_34 = arith.constant 0 : index
      %44 = arith.index_cast %43 : i32 to index
      %c1_35 = arith.constant 1 : index
      %c0_36 = arith.constant 0 : index
      %45 = vector.load %arg1[%c0_34, %44, %c1_35, %c0_36] : memref<1x10x10x16xf32, #tpu.memory_space<vmem>>, vector<1x1x8x16xf32>
      %46 = vector.shape_cast %45 : vector<1x1x8x16xf32> to vector<8x16xf32>
      %47 = arith.truncf %46 : vector<8x16xf32> to vector<8x16xbf16>
      %c4 = arith.constant 4 : index
      %c0_37 = arith.constant 0 : index
      %c0_38 = arith.constant 0 : index
      %48 = vector.load %arg2[%c4, %c0_37, %c0_38] : memref<9x16x32xbf16, #tpu.memory_space<vmem>>, vector<1x16x32xbf16>
      %49 = vector.shape_cast %48 : vector<1x16x32xbf16> to vector<16x32xbf16>
      %cst_39 = arith.constant dense<0.000000e+00> : vector<8x32xf32>
      %50 = tpu.matmul %47, %49, %cst_39 {dimension_numbers = #tpu.dot_dimension_numbers<[1], [0], [0], [1], [0, 0, 1, 1], [], []>} : vector<8x16xbf16>, vector<16x32xbf16>, vector<8x32xf32> -> vector<8x32xf32>
      %51 = arith.addf %42, %50 : vector<8x32xf32>
      %c1_i32_40 = arith.constant 1 : i32
      %52 = arith.addi %2, %c1_i32_40 : i32
      %c0_41 = arith.constant 0 : index
      %53 = arith.index_cast %52 : i32 to index
      %c2_42 = arith.constant 2 : index
      %c0_43 = arith.constant 0 : index
      %54 = vector.load %arg1[%c0_41, %53, %c2_42, %c0_43] : memref<1x10x10x16xf32, #tpu.memory_space<vmem>>, vector<1x1x8x16xf32>
      %55 = vector.shape_cast %54 : vector<1x1x8x16xf32> to vector<8x16xf32>
      %56 = arith.truncf %55 : vector<8x16xf32> to vector<8x16xbf16>
      %c5 = arith.constant 5 : index
      %c0_44 = arith.constant 0 : index
      %c0_45 = arith.constant 0 : index
      %57 = vector.load %arg2[%c5, %c0_44, %c0_45] : memref<9x16x32xbf16, #tpu.memory_space<vmem>>, vector<1x16x32xbf16>
      %58 = vector.shape_cast %57 : vector<1x16x32xbf16> to vector<16x32xbf16>
      %cst_46 = arith.constant dense<0.000000e+00> : vector<8x32xf32>
      %59 = tpu.matmul %56, %58, %cst_46 {dimension_numbers = #tpu.dot_dimension_numbers<[1], [0], [0], [1], [0, 0, 1, 1], [], []>} : vector<8x16xbf16>, vector<16x32xbf16>, vector<8x32xf32> -> vector<8x32xf32>
      %60 = arith.addf %51, %59 : vector<8x32xf32>
      %c2_i32 = arith.constant 2 : i32
      %61 = arith.addi %2, %c2_i32 : i32
      %c0_47 = arith.constant 0 : index
      %62 = arith.index_cast %61 : i32 to index
      %c0_48 = arith.constant 0 : index
      %c0_49 = arith.constant 0 : index
      %63 = vector.load %arg1[%c0_47, %62, %c0_48, %c0_49] : memref<1x10x10x16xf32, #tpu.memory_space<vmem>>, vector<1x1x8x16xf32>
      %64 = vector.shape_cast %63 : vector<1x1x8x16xf32> to vector<8x16xf32>
      %65 = arith.truncf %64 : vector<8x16xf32> to vector<8x16xbf16>
      %c6 = arith.constant 6 : index
      %c0_50 = arith.constant 0 : index
      %c0_51 = arith.constant 0 : index
      %66 = vector.load %arg2[%c6, %c0_50, %c0_51] : memref<9x16x32xbf16, #tpu.memory_space<vmem>>, vector<1x16x32xbf16>
      %67 = vector.shape_cast %66 : vector<1x16x32xbf16> to vector<16x32xbf16>
      %cst_52 = arith.constant dense<0.000000e+00> : vector<8x32xf32>
      %68 = tpu.matmul %65, %67, %cst_52 {dimension_numbers = #tpu.dot_dimension_numbers<[1], [0], [0], [1], [0, 0, 1, 1], [], []>} : vector<8x16xbf16>, vector<16x32xbf16>, vector<8x32xf32> -> vector<8x32xf32>
      %69 = arith.addf %60, %68 : vector<8x32xf32>
      %c2_i32_53 = arith.constant 2 : i32
      %70 = arith.addi %2, %c2_i32_53 : i32
      %c0_54 = arith.constant 0 : index
      %71 = arith.index_cast %70 : i32 to index
      %c1_55 = arith.constant 1 : index
      %c0_56 = arith.constant 0 : index
      %72 = vector.load %arg1[%c0_54, %71, %c1_55, %c0_56] : memref<1x10x10x16xf32, #tpu.memory_space<vmem>>, vector<1x1x8x16xf32>
      %73 = vector.shape_cast %72 : vector<1x1x8x16xf32> to vector<8x16xf32>
      %74 = arith.truncf %73 : vector<8x16xf32> to vector<8x16xbf16>
      %c7 = arith.constant 7 : index
      %c0_57 = arith.constant 0 : index
      %c0_58 = arith.constant 0 : index
      %75 = vector.load %arg2[%c7, %c0_57, %c0_58] : memref<9x16x32xbf16, #tpu.memory_space<vmem>>, vector<1x16x32xbf16>
      %76 = vector.shape_cast %75 : vector<1x16x32xbf16> to vector<16x32xbf16>
      %cst_59 = arith.constant dense<0.000000e+00> : vector<8x32xf32>
      %77 = tpu.matmul %74, %76, %cst_59 {dimension_numbers = #tpu.dot_dimension_numbers<[1], [0], [0], [1], [0, 0, 1, 1], [], []>} : vector<8x16xbf16>, vector<16x32xbf16>, vector<8x32xf32> -> vector<8x32xf32>
      %78 = arith.addf %69, %77 : vector<8x32xf32>
      %c2_i32_60 = arith.constant 2 : i32
      %79 = arith.addi %2, %c2_i32_60 : i32
      %c0_61 = arith.constant 0 : index
      %80 = arith.index_cast %79 : i32 to index
      %c2_62 = arith.constant 2 : index
      %c0_63 = arith.constant 0 : index
      %81 = vector.load %arg1[%c0_61, %80, %c2_62, %c0_63] : memref<1x10x10x16xf32, #tpu.memory_space<vmem>>, vector<1x1x8x16xf32>
      %82 = vector.shape_cast %81 : vector<1x1x8x16xf32> to vector<8x16xf32>
      %83 = arith.truncf %82 : vector<8x16xf32> to vector<8x16xbf16>
      %c8 = arith.constant 8 : index
      %c0_64 = arith.constant 0 : index
      %c0_65 = arith.constant 0 : index
      %84 = vector.load %arg2[%c8, %c0_64, %c0_65] : memref<9x16x32xbf16, #tpu.memory_space<vmem>>, vector<1x16x32xbf16>
      %85 = vector.shape_cast %84 : vector<1x16x32xbf16> to vector<16x32xbf16>
      %cst_66 = arith.constant dense<0.000000e+00> : vector<8x32xf32>
      %86 = tpu.matmul %83, %85, %cst_66 {dimension_numbers = #tpu.dot_dimension_numbers<[1], [0], [0], [1], [0, 0, 1, 1], [], []>} : vector<8x16xbf16>, vector<16x32xbf16>, vector<8x32xf32> -> vector<8x32xf32>
      %87 = arith.addf %78, %86 : vector<8x32xf32>
      %cst_67 = arith.constant 0.000000e+00 : f32
      %88 = vector.broadcast %cst_67 : f32 to vector<8x32xf32>
      %89 = arith.maximumf %87, %88 : vector<8x32xf32>
      %90 = vector.extract_strided_slice %89 {offsets = [0, 0], sizes = [8, 16], strides = [1, 1]} : vector<8x32xf32> to vector<8x16xf32>
      %91 = vector.extract_strided_slice %89 {offsets = [0, 16], sizes = [8, 16], strides = [1, 1]} : vector<8x32xf32> to vector<8x16xf32>
      %92 = arith.mulf %90, %91 : vector<8x16xf32>
      %93 = arith.truncf %92 : vector<8x16xf32> to vector<8x16xbf16>
      %c0_68 = arith.constant 0 : index
      %c0_69 = arith.constant 0 : index
      %94 = vector.load %arg4[%c0_68, %c0_69] : memref<16x12xbf16, #tpu.memory_space<vmem>>, vector<16x12xbf16>
      %cst_70 = arith.constant dense<0.000000e+00> : vector<8x12xf32>
      %95 = tpu.matmul %93, %94, %cst_70 {dimension_numbers = #tpu.dot_dimension_numbers<[1], [0], [0], [1], [0, 0, 1, 1], [], []>} : vector<8x16xbf16>, vector<16x12xbf16>, vector<8x12xf32> -> vector<8x12xf32>
      %c0_71 = arith.constant 0 : index
      %c0_72 = arith.constant 0 : index
      %96 = vector.load %arg5[%c0_71, %c0_72] : memref<1x12xf32, #tpu.memory_space<vmem>>, vector<1x12xf32>
      %97 = vector.broadcast %96 : vector<1x12xf32> to vector<8x12xf32>
      %98 = arith.addf %95, %97 : vector<8x12xf32>
      %c0_73 = arith.constant 0 : index
      %99 = arith.index_cast %2 : i32 to index
      %c0_74 = arith.constant 0 : index
      %c0_75 = arith.constant 0 : index
      %100 = vector.load %arg6[%c0_73, %99, %c0_74, %c0_75] : memref<1x8x8x12xf32, #tpu.memory_space<vmem>>, vector<1x1x8x12xf32>
      %101 = vector.shape_cast %100 : vector<1x1x8x12xf32> to vector<8x12xf32>
      %102 = vector.shape_cast %98 : vector<8x12xf32> to vector<1x1x8x12xf32>
      tpu.vector_store %arg6[%c0_73, %99, %c0_74, %c0_75], %102 {strides = array<i32>} : memref<1x8x8x12xf32, #tpu.memory_space<vmem>>, vector<1x1x8x12xf32>,
    }
    %c8_i32_0 = arith.constant 8 : i32
    return
  }
  func.func @transform_0(%arg0: i32) -> (i32, i32, i32, i32) {
    %c0_i32 = arith.constant 0 : i32
    %c0_i32_0 = arith.constant 0 : i32
    %c0_i32_1 = arith.constant 0 : i32
    %c0_i32_2 = arith.constant 0 : i32
    return %arg0, %c0_i32, %c0_i32_0, %c0_i32_1 : i32, i32, i32, i32
  }
  func.func @transform_1(%arg0: i32) -> (i32, i32, i32) {
    %c0_i32 = arith.constant 0 : i32
    %c0_i32_0 = arith.constant 0 : i32
    %c0_i32_1 = arith.constant 0 : i32
    %c0_i32_2 = arith.constant 0 : i32
    return %c0_i32, %c0_i32_0, %c0_i32_1 : i32, i32, i32
  }
  func.func @transform_2(%arg0: i32) -> (i32, i32) {
    %c0_i32 = arith.constant 0 : i32
    %c0_i32_0 = arith.constant 0 : i32
    %c0_i32_1 = arith.constant 0 : i32
    return %c0_i32, %c0_i32_0 : i32, i32
  }
  func.func @transform_3(%arg0: i32) -> (i32, i32) {
    %c0_i32 = arith.constant 0 : i32
    %c0_i32_0 = arith.constant 0 : i32
    %c0_i32_1 = arith.constant 0 : i32
    return %c0_i32, %c0_i32_0 : i32, i32
  }
  func.func @transform_4(%arg0: i32) -> (i32, i32) {
    %c0_i32 = arith.constant 0 : i32
    %c0_i32_0 = arith.constant 0 : i32
    %c0_i32_1 = arith.constant 0 : i32
    return %c0_i32, %c0_i32_0 : i32, i32
  }
  func.func @transform_5(%arg0: i32) -> (i32, i32, i32, i32) {
    %c0_i32 = arith.constant 0 : i32
    %c0_i32_0 = arith.constant 0 : i32
    %c0_i32_1 = arith.constant 0 : i32
    %c0_i32_2 = arith.constant 0 : i32
    return %arg0, %c0_i32, %c0_i32_0, %c0_i32_1 : i32, i32, i32, i32
  }
}

module attributes {stable_mosaic.version = 11 : i64} {
  func.func @_fullres_kernel(%arg0: i32, %arg1: memref<1x16x16x3xf32, #tpu.memory_space<vmem>>, %arg2: memref<16x16x3xf32, #tpu.memory_space<vmem>>, %arg3: memref<1x16x16x3xf32, #tpu.memory_space<vmem>>, %arg4: memref<9x3x16xbf16, #tpu.memory_space<vmem>>, %arg5: memref<9x3x16xbf16, #tpu.memory_space<vmem>>, %arg6: memref<1x16xf32, #tpu.memory_space<vmem>>, %arg7: memref<16x3xbf16, #tpu.memory_space<vmem>>, %arg8: memref<1x3xf32, #tpu.memory_space<vmem>>, %arg9: memref<1x14x14x3xf32, #tpu.memory_space<vmem>>) attributes {dimension_semantics = [#tpu.dimension_semantics<parallel>], iteration_bounds = array<i64: 2>, scalar_prefetch = 0 : i64, scratch_operands = 0 : i64, tpu.core_type = #tpu.core_type<tc>, window_params = [{transform_indices = @transform_0, window_bounds = array<i64: 1, 16, 16, 3>}, {pipeline_mode = #tpu.pipeline_mode<synchronous>, transform_indices = @transform_1, window_bounds = array<i64: 16, 16, 3>}, {transform_indices = @transform_2, window_bounds = array<i64: 1, 16, 16, 3>}, {pipeline_mode = #tpu.pipeline_mode<synchronous>, transform_indices = @transform_3, window_bounds = array<i64: 9, 3, 16>}, {pipeline_mode = #tpu.pipeline_mode<synchronous>, transform_indices = @transform_4, window_bounds = array<i64: 9, 3, 16>}, {pipeline_mode = #tpu.pipeline_mode<synchronous>, transform_indices = @transform_5, window_bounds = array<i64: 1, 16>}, {pipeline_mode = #tpu.pipeline_mode<synchronous>, transform_indices = @transform_6, window_bounds = array<i64: 16, 3>}, {pipeline_mode = #tpu.pipeline_mode<synchronous>, transform_indices = @transform_7, window_bounds = array<i64: 1, 3>}, {transform_indices = @transform_8, window_bounds = array<i64: 1, 14, 14, 3>}]} {
    %c0_i32 = arith.constant 0 : i32
    %c14_i32 = arith.constant 14 : i32
    %0 = arith.addi %c0_i32, %c14_i32 : i32
    %c1_i32 = arith.constant 1 : i32
    scf.for %arg10 = %c0_i32 to %0 step %c1_i32  : i32 {
      %c1_i32_1 = arith.constant 1 : i32
      %1 = arith.muli %arg10, %c1_i32_1 : i32
      %c0_i32_2 = arith.constant 0 : i32
      %2 = arith.addi %c0_i32_2, %1 : i32
      %cst = arith.constant 0.000000e+00 : f32
      %3 = vector.broadcast %cst : f32 to vector<14x16xf32>
      %c0 = arith.constant 0 : index
      %c0_3 = arith.constant 0 : index
      %4 = vector.load %arg6[%c0, %c0_3] : memref<1x16xf32, #tpu.memory_space<vmem>>, vector<1x16xf32>
      %5 = vector.broadcast %4 : vector<1x16xf32> to vector<14x16xf32>
      %6 = arith.addf %3, %5 : vector<14x16xf32>
      %c0_i32_4 = arith.constant 0 : i32
      %7 = arith.addi %2, %c0_i32_4 : i32
      %c0_5 = arith.constant 0 : index
      %8 = arith.index_cast %7 : i32 to index
      %c0_6 = arith.constant 0 : index
      %c0_7 = arith.constant 0 : index
      %9 = vector.load %arg1[%c0_5, %8, %c0_6, %c0_7] : memref<1x16x16x3xf32, #tpu.memory_space<vmem>>, vector<1x1x14x3xf32>
      %10 = vector.shape_cast %9 : vector<1x1x14x3xf32> to vector<14x3xf32>
      %c0_i32_8 = arith.constant 0 : i32
      %11 = arith.addi %2, %c0_i32_8 : i32
      %12 = arith.index_cast %11 : i32 to index
      %c0_9 = arith.constant 0 : index
      %c0_10 = arith.constant 0 : index
      %13 = vector.load %arg2[%12, %c0_9, %c0_10] : memref<16x16x3xf32, #tpu.memory_space<vmem>>, vector<1x14x3xf32>
      %14 = vector.shape_cast %13 : vector<1x14x3xf32> to vector<14x3xf32>
      %15 = arith.mulf %10, %14 : vector<14x3xf32>
      %16 = arith.truncf %15 : vector<14x3xf32> to vector<14x3xbf16>
      %c0_11 = arith.constant 0 : index
      %c0_12 = arith.constant 0 : index
      %c0_13 = arith.constant 0 : index
      %17 = vector.load %arg4[%c0_11, %c0_12, %c0_13] : memref<9x3x16xbf16, #tpu.memory_space<vmem>>, vector<1x3x16xbf16>
      %18 = vector.shape_cast %17 : vector<1x3x16xbf16> to vector<3x16xbf16>
      %cst_14 = arith.constant dense<0.000000e+00> : vector<14x16xf32>
      %19 = tpu.matmul %16, %18, %cst_14 {dimension_numbers = #tpu.dot_dimension_numbers<[1], [0], [0], [1], [0, 0, 1, 1], [], []>} : vector<14x3xbf16>, vector<3x16xbf16>, vector<14x16xf32> -> vector<14x16xf32>
      %20 = arith.addf %6, %19 : vector<14x16xf32>
      %c0_i32_15 = arith.constant 0 : i32
      %21 = arith.addi %2, %c0_i32_15 : i32
      %c0_16 = arith.constant 0 : index
      %22 = arith.index_cast %21 : i32 to index
      %c0_17 = arith.constant 0 : index
      %c0_18 = arith.constant 0 : index
      %23 = vector.load %arg3[%c0_16, %22, %c0_17, %c0_18] : memref<1x16x16x3xf32, #tpu.memory_space<vmem>>, vector<1x1x14x3xf32>
      %24 = vector.shape_cast %23 : vector<1x1x14x3xf32> to vector<14x3xf32>
      %25 = arith.truncf %24 : vector<14x3xf32> to vector<14x3xbf16>
      %c0_19 = arith.constant 0 : index
      %c0_20 = arith.constant 0 : index
      %c0_21 = arith.constant 0 : index
      %26 = vector.load %arg5[%c0_19, %c0_20, %c0_21] : memref<9x3x16xbf16, #tpu.memory_space<vmem>>, vector<1x3x16xbf16>
      %27 = vector.shape_cast %26 : vector<1x3x16xbf16> to vector<3x16xbf16>
      %cst_22 = arith.constant dense<0.000000e+00> : vector<14x16xf32>
      %28 = tpu.matmul %25, %27, %cst_22 {dimension_numbers = #tpu.dot_dimension_numbers<[1], [0], [0], [1], [0, 0, 1, 1], [], []>} : vector<14x3xbf16>, vector<3x16xbf16>, vector<14x16xf32> -> vector<14x16xf32>
      %29 = arith.addf %20, %28 : vector<14x16xf32>
      %c0_i32_23 = arith.constant 0 : i32
      %30 = arith.addi %2, %c0_i32_23 : i32
      %c0_24 = arith.constant 0 : index
      %31 = arith.index_cast %30 : i32 to index
      %c1 = arith.constant 1 : index
      %c0_25 = arith.constant 0 : index
      %32 = vector.load %arg1[%c0_24, %31, %c1, %c0_25] : memref<1x16x16x3xf32, #tpu.memory_space<vmem>>, vector<1x1x14x3xf32>
      %33 = vector.shape_cast %32 : vector<1x1x14x3xf32> to vector<14x3xf32>
      %c0_i32_26 = arith.constant 0 : i32
      %34 = arith.addi %2, %c0_i32_26 : i32
      %35 = arith.index_cast %34 : i32 to index
      %c1_27 = arith.constant 1 : index
      %c0_28 = arith.constant 0 : index
      %36 = vector.load %arg2[%35, %c1_27, %c0_28] : memref<16x16x3xf32, #tpu.memory_space<vmem>>, vector<1x14x3xf32>
      %37 = vector.shape_cast %36 : vector<1x14x3xf32> to vector<14x3xf32>
      %38 = arith.mulf %33, %37 : vector<14x3xf32>
      %39 = arith.truncf %38 : vector<14x3xf32> to vector<14x3xbf16>
      %c1_29 = arith.constant 1 : index
      %c0_30 = arith.constant 0 : index
      %c0_31 = arith.constant 0 : index
      %40 = vector.load %arg4[%c1_29, %c0_30, %c0_31] : memref<9x3x16xbf16, #tpu.memory_space<vmem>>, vector<1x3x16xbf16>
      %41 = vector.shape_cast %40 : vector<1x3x16xbf16> to vector<3x16xbf16>
      %cst_32 = arith.constant dense<0.000000e+00> : vector<14x16xf32>
      %42 = tpu.matmul %39, %41, %cst_32 {dimension_numbers = #tpu.dot_dimension_numbers<[1], [0], [0], [1], [0, 0, 1, 1], [], []>} : vector<14x3xbf16>, vector<3x16xbf16>, vector<14x16xf32> -> vector<14x16xf32>
      %43 = arith.addf %29, %42 : vector<14x16xf32>
      %c0_i32_33 = arith.constant 0 : i32
      %44 = arith.addi %2, %c0_i32_33 : i32
      %c0_34 = arith.constant 0 : index
      %45 = arith.index_cast %44 : i32 to index
      %c1_35 = arith.constant 1 : index
      %c0_36 = arith.constant 0 : index
      %46 = vector.load %arg3[%c0_34, %45, %c1_35, %c0_36] : memref<1x16x16x3xf32, #tpu.memory_space<vmem>>, vector<1x1x14x3xf32>
      %47 = vector.shape_cast %46 : vector<1x1x14x3xf32> to vector<14x3xf32>
      %48 = arith.truncf %47 : vector<14x3xf32> to vector<14x3xbf16>
      %c1_37 = arith.constant 1 : index
      %c0_38 = arith.constant 0 : index
      %c0_39 = arith.constant 0 : index
      %49 = vector.load %arg5[%c1_37, %c0_38, %c0_39] : memref<9x3x16xbf16, #tpu.memory_space<vmem>>, vector<1x3x16xbf16>
      %50 = vector.shape_cast %49 : vector<1x3x16xbf16> to vector<3x16xbf16>
      %cst_40 = arith.constant dense<0.000000e+00> : vector<14x16xf32>
      %51 = tpu.matmul %48, %50, %cst_40 {dimension_numbers = #tpu.dot_dimension_numbers<[1], [0], [0], [1], [0, 0, 1, 1], [], []>} : vector<14x3xbf16>, vector<3x16xbf16>, vector<14x16xf32> -> vector<14x16xf32>
      %52 = arith.addf %43, %51 : vector<14x16xf32>
      %c0_i32_41 = arith.constant 0 : i32
      %53 = arith.addi %2, %c0_i32_41 : i32
      %c0_42 = arith.constant 0 : index
      %54 = arith.index_cast %53 : i32 to index
      %c2 = arith.constant 2 : index
      %c0_43 = arith.constant 0 : index
      %55 = vector.load %arg1[%c0_42, %54, %c2, %c0_43] : memref<1x16x16x3xf32, #tpu.memory_space<vmem>>, vector<1x1x14x3xf32>
      %56 = vector.shape_cast %55 : vector<1x1x14x3xf32> to vector<14x3xf32>
      %c0_i32_44 = arith.constant 0 : i32
      %57 = arith.addi %2, %c0_i32_44 : i32
      %58 = arith.index_cast %57 : i32 to index
      %c2_45 = arith.constant 2 : index
      %c0_46 = arith.constant 0 : index
      %59 = vector.load %arg2[%58, %c2_45, %c0_46] : memref<16x16x3xf32, #tpu.memory_space<vmem>>, vector<1x14x3xf32>
      %60 = vector.shape_cast %59 : vector<1x14x3xf32> to vector<14x3xf32>
      %61 = arith.mulf %56, %60 : vector<14x3xf32>
      %62 = arith.truncf %61 : vector<14x3xf32> to vector<14x3xbf16>
      %c2_47 = arith.constant 2 : index
      %c0_48 = arith.constant 0 : index
      %c0_49 = arith.constant 0 : index
      %63 = vector.load %arg4[%c2_47, %c0_48, %c0_49] : memref<9x3x16xbf16, #tpu.memory_space<vmem>>, vector<1x3x16xbf16>
      %64 = vector.shape_cast %63 : vector<1x3x16xbf16> to vector<3x16xbf16>
      %cst_50 = arith.constant dense<0.000000e+00> : vector<14x16xf32>
      %65 = tpu.matmul %62, %64, %cst_50 {dimension_numbers = #tpu.dot_dimension_numbers<[1], [0], [0], [1], [0, 0, 1, 1], [], []>} : vector<14x3xbf16>, vector<3x16xbf16>, vector<14x16xf32> -> vector<14x16xf32>
      %66 = arith.addf %52, %65 : vector<14x16xf32>
      %c0_i32_51 = arith.constant 0 : i32
      %67 = arith.addi %2, %c0_i32_51 : i32
      %c0_52 = arith.constant 0 : index
      %68 = arith.index_cast %67 : i32 to index
      %c2_53 = arith.constant 2 : index
      %c0_54 = arith.constant 0 : index
      %69 = vector.load %arg3[%c0_52, %68, %c2_53, %c0_54] : memref<1x16x16x3xf32, #tpu.memory_space<vmem>>, vector<1x1x14x3xf32>
      %70 = vector.shape_cast %69 : vector<1x1x14x3xf32> to vector<14x3xf32>
      %71 = arith.truncf %70 : vector<14x3xf32> to vector<14x3xbf16>
      %c2_55 = arith.constant 2 : index
      %c0_56 = arith.constant 0 : index
      %c0_57 = arith.constant 0 : index
      %72 = vector.load %arg5[%c2_55, %c0_56, %c0_57] : memref<9x3x16xbf16, #tpu.memory_space<vmem>>, vector<1x3x16xbf16>
      %73 = vector.shape_cast %72 : vector<1x3x16xbf16> to vector<3x16xbf16>
      %cst_58 = arith.constant dense<0.000000e+00> : vector<14x16xf32>
      %74 = tpu.matmul %71, %73, %cst_58 {dimension_numbers = #tpu.dot_dimension_numbers<[1], [0], [0], [1], [0, 0, 1, 1], [], []>} : vector<14x3xbf16>, vector<3x16xbf16>, vector<14x16xf32> -> vector<14x16xf32>
      %75 = arith.addf %66, %74 : vector<14x16xf32>
      %c1_i32_59 = arith.constant 1 : i32
      %76 = arith.addi %2, %c1_i32_59 : i32
      %c0_60 = arith.constant 0 : index
      %77 = arith.index_cast %76 : i32 to index
      %c0_61 = arith.constant 0 : index
      %c0_62 = arith.constant 0 : index
      %78 = vector.load %arg1[%c0_60, %77, %c0_61, %c0_62] : memref<1x16x16x3xf32, #tpu.memory_space<vmem>>, vector<1x1x14x3xf32>
      %79 = vector.shape_cast %78 : vector<1x1x14x3xf32> to vector<14x3xf32>
      %c1_i32_63 = arith.constant 1 : i32
      %80 = arith.addi %2, %c1_i32_63 : i32
      %81 = arith.index_cast %80 : i32 to index
      %c0_64 = arith.constant 0 : index
      %c0_65 = arith.constant 0 : index
      %82 = vector.load %arg2[%81, %c0_64, %c0_65] : memref<16x16x3xf32, #tpu.memory_space<vmem>>, vector<1x14x3xf32>
      %83 = vector.shape_cast %82 : vector<1x14x3xf32> to vector<14x3xf32>
      %84 = arith.mulf %79, %83 : vector<14x3xf32>
      %85 = arith.truncf %84 : vector<14x3xf32> to vector<14x3xbf16>
      %c3 = arith.constant 3 : index
      %c0_66 = arith.constant 0 : index
      %c0_67 = arith.constant 0 : index
      %86 = vector.load %arg4[%c3, %c0_66, %c0_67] : memref<9x3x16xbf16, #tpu.memory_space<vmem>>, vector<1x3x16xbf16>
      %87 = vector.shape_cast %86 : vector<1x3x16xbf16> to vector<3x16xbf16>
      %cst_68 = arith.constant dense<0.000000e+00> : vector<14x16xf32>
      %88 = tpu.matmul %85, %87, %cst_68 {dimension_numbers = #tpu.dot_dimension_numbers<[1], [0], [0], [1], [0, 0, 1, 1], [], []>} : vector<14x3xbf16>, vector<3x16xbf16>, vector<14x16xf32> -> vector<14x16xf32>
      %89 = arith.addf %75, %88 : vector<14x16xf32>
      %c1_i32_69 = arith.constant 1 : i32
      %90 = arith.addi %2, %c1_i32_69 : i32
      %c0_70 = arith.constant 0 : index
      %91 = arith.index_cast %90 : i32 to index
      %c0_71 = arith.constant 0 : index
      %c0_72 = arith.constant 0 : index
      %92 = vector.load %arg3[%c0_70, %91, %c0_71, %c0_72] : memref<1x16x16x3xf32, #tpu.memory_space<vmem>>, vector<1x1x14x3xf32>
      %93 = vector.shape_cast %92 : vector<1x1x14x3xf32> to vector<14x3xf32>
      %94 = arith.truncf %93 : vector<14x3xf32> to vector<14x3xbf16>
      %c3_73 = arith.constant 3 : index
      %c0_74 = arith.constant 0 : index
      %c0_75 = arith.constant 0 : index
      %95 = vector.load %arg5[%c3_73, %c0_74, %c0_75] : memref<9x3x16xbf16, #tpu.memory_space<vmem>>, vector<1x3x16xbf16>
      %96 = vector.shape_cast %95 : vector<1x3x16xbf16> to vector<3x16xbf16>
      %cst_76 = arith.constant dense<0.000000e+00> : vector<14x16xf32>
      %97 = tpu.matmul %94, %96, %cst_76 {dimension_numbers = #tpu.dot_dimension_numbers<[1], [0], [0], [1], [0, 0, 1, 1], [], []>} : vector<14x3xbf16>, vector<3x16xbf16>, vector<14x16xf32> -> vector<14x16xf32>
      %98 = arith.addf %89, %97 : vector<14x16xf32>
      %c1_i32_77 = arith.constant 1 : i32
      %99 = arith.addi %2, %c1_i32_77 : i32
      %c0_78 = arith.constant 0 : index
      %100 = arith.index_cast %99 : i32 to index
      %c1_79 = arith.constant 1 : index
      %c0_80 = arith.constant 0 : index
      %101 = vector.load %arg1[%c0_78, %100, %c1_79, %c0_80] : memref<1x16x16x3xf32, #tpu.memory_space<vmem>>, vector<1x1x14x3xf32>
      %102 = vector.shape_cast %101 : vector<1x1x14x3xf32> to vector<14x3xf32>
      %c1_i32_81 = arith.constant 1 : i32
      %103 = arith.addi %2, %c1_i32_81 : i32
      %104 = arith.index_cast %103 : i32 to index
      %c1_82 = arith.constant 1 : index
      %c0_83 = arith.constant 0 : index
      %105 = vector.load %arg2[%104, %c1_82, %c0_83] : memref<16x16x3xf32, #tpu.memory_space<vmem>>, vector<1x14x3xf32>
      %106 = vector.shape_cast %105 : vector<1x14x3xf32> to vector<14x3xf32>
      %107 = arith.mulf %102, %106 : vector<14x3xf32>
      %108 = arith.truncf %107 : vector<14x3xf32> to vector<14x3xbf16>
      %c4 = arith.constant 4 : index
      %c0_84 = arith.constant 0 : index
      %c0_85 = arith.constant 0 : index
      %109 = vector.load %arg4[%c4, %c0_84, %c0_85] : memref<9x3x16xbf16, #tpu.memory_space<vmem>>, vector<1x3x16xbf16>
      %110 = vector.shape_cast %109 : vector<1x3x16xbf16> to vector<3x16xbf16>
      %cst_86 = arith.constant dense<0.000000e+00> : vector<14x16xf32>
      %111 = tpu.matmul %108, %110, %cst_86 {dimension_numbers = #tpu.dot_dimension_numbers<[1], [0], [0], [1], [0, 0, 1, 1], [], []>} : vector<14x3xbf16>, vector<3x16xbf16>, vector<14x16xf32> -> vector<14x16xf32>
      %112 = arith.addf %98, %111 : vector<14x16xf32>
      %c1_i32_87 = arith.constant 1 : i32
      %113 = arith.addi %2, %c1_i32_87 : i32
      %c0_88 = arith.constant 0 : index
      %114 = arith.index_cast %113 : i32 to index
      %c1_89 = arith.constant 1 : index
      %c0_90 = arith.constant 0 : index
      %115 = vector.load %arg3[%c0_88, %114, %c1_89, %c0_90] : memref<1x16x16x3xf32, #tpu.memory_space<vmem>>, vector<1x1x14x3xf32>
      %116 = vector.shape_cast %115 : vector<1x1x14x3xf32> to vector<14x3xf32>
      %117 = arith.truncf %116 : vector<14x3xf32> to vector<14x3xbf16>
      %c4_91 = arith.constant 4 : index
      %c0_92 = arith.constant 0 : index
      %c0_93 = arith.constant 0 : index
      %118 = vector.load %arg5[%c4_91, %c0_92, %c0_93] : memref<9x3x16xbf16, #tpu.memory_space<vmem>>, vector<1x3x16xbf16>
      %119 = vector.shape_cast %118 : vector<1x3x16xbf16> to vector<3x16xbf16>
      %cst_94 = arith.constant dense<0.000000e+00> : vector<14x16xf32>
      %120 = tpu.matmul %117, %119, %cst_94 {dimension_numbers = #tpu.dot_dimension_numbers<[1], [0], [0], [1], [0, 0, 1, 1], [], []>} : vector<14x3xbf16>, vector<3x16xbf16>, vector<14x16xf32> -> vector<14x16xf32>
      %121 = arith.addf %112, %120 : vector<14x16xf32>
      %c1_i32_95 = arith.constant 1 : i32
      %122 = arith.addi %2, %c1_i32_95 : i32
      %c0_96 = arith.constant 0 : index
      %123 = arith.index_cast %122 : i32 to index
      %c2_97 = arith.constant 2 : index
      %c0_98 = arith.constant 0 : index
      %124 = vector.load %arg1[%c0_96, %123, %c2_97, %c0_98] : memref<1x16x16x3xf32, #tpu.memory_space<vmem>>, vector<1x1x14x3xf32>
      %125 = vector.shape_cast %124 : vector<1x1x14x3xf32> to vector<14x3xf32>
      %c1_i32_99 = arith.constant 1 : i32
      %126 = arith.addi %2, %c1_i32_99 : i32
      %127 = arith.index_cast %126 : i32 to index
      %c2_100 = arith.constant 2 : index
      %c0_101 = arith.constant 0 : index
      %128 = vector.load %arg2[%127, %c2_100, %c0_101] : memref<16x16x3xf32, #tpu.memory_space<vmem>>, vector<1x14x3xf32>
      %129 = vector.shape_cast %128 : vector<1x14x3xf32> to vector<14x3xf32>
      %130 = arith.mulf %125, %129 : vector<14x3xf32>
      %131 = arith.truncf %130 : vector<14x3xf32> to vector<14x3xbf16>
      %c5 = arith.constant 5 : index
      %c0_102 = arith.constant 0 : index
      %c0_103 = arith.constant 0 : index
      %132 = vector.load %arg4[%c5, %c0_102, %c0_103] : memref<9x3x16xbf16, #tpu.memory_space<vmem>>, vector<1x3x16xbf16>
      %133 = vector.shape_cast %132 : vector<1x3x16xbf16> to vector<3x16xbf16>
      %cst_104 = arith.constant dense<0.000000e+00> : vector<14x16xf32>
      %134 = tpu.matmul %131, %133, %cst_104 {dimension_numbers = #tpu.dot_dimension_numbers<[1], [0], [0], [1], [0, 0, 1, 1], [], []>} : vector<14x3xbf16>, vector<3x16xbf16>, vector<14x16xf32> -> vector<14x16xf32>
      %135 = arith.addf %121, %134 : vector<14x16xf32>
      %c1_i32_105 = arith.constant 1 : i32
      %136 = arith.addi %2, %c1_i32_105 : i32
      %c0_106 = arith.constant 0 : index
      %137 = arith.index_cast %136 : i32 to index
      %c2_107 = arith.constant 2 : index
      %c0_108 = arith.constant 0 : index
      %138 = vector.load %arg3[%c0_106, %137, %c2_107, %c0_108] : memref<1x16x16x3xf32, #tpu.memory_space<vmem>>, vector<1x1x14x3xf32>
      %139 = vector.shape_cast %138 : vector<1x1x14x3xf32> to vector<14x3xf32>
      %140 = arith.truncf %139 : vector<14x3xf32> to vector<14x3xbf16>
      %c5_109 = arith.constant 5 : index
      %c0_110 = arith.constant 0 : index
      %c0_111 = arith.constant 0 : index
      %141 = vector.load %arg5[%c5_109, %c0_110, %c0_111] : memref<9x3x16xbf16, #tpu.memory_space<vmem>>, vector<1x3x16xbf16>
      %142 = vector.shape_cast %141 : vector<1x3x16xbf16> to vector<3x16xbf16>
      %cst_112 = arith.constant dense<0.000000e+00> : vector<14x16xf32>
      %143 = tpu.matmul %140, %142, %cst_112 {dimension_numbers = #tpu.dot_dimension_numbers<[1], [0], [0], [1], [0, 0, 1, 1], [], []>} : vector<14x3xbf16>, vector<3x16xbf16>, vector<14x16xf32> -> vector<14x16xf32>
      %144 = arith.addf %135, %143 : vector<14x16xf32>
      %c2_i32 = arith.constant 2 : i32
      %145 = arith.addi %2, %c2_i32 : i32
      %c0_113 = arith.constant 0 : index
      %146 = arith.index_cast %145 : i32 to index
      %c0_114 = arith.constant 0 : index
      %c0_115 = arith.constant 0 : index
      %147 = vector.load %arg1[%c0_113, %146, %c0_114, %c0_115] : memref<1x16x16x3xf32, #tpu.memory_space<vmem>>, vector<1x1x14x3xf32>
      %148 = vector.shape_cast %147 : vector<1x1x14x3xf32> to vector<14x3xf32>
      %c2_i32_116 = arith.constant 2 : i32
      %149 = arith.addi %2, %c2_i32_116 : i32
      %150 = arith.index_cast %149 : i32 to index
      %c0_117 = arith.constant 0 : index
      %c0_118 = arith.constant 0 : index
      %151 = vector.load %arg2[%150, %c0_117, %c0_118] : memref<16x16x3xf32, #tpu.memory_space<vmem>>, vector<1x14x3xf32>
      %152 = vector.shape_cast %151 : vector<1x14x3xf32> to vector<14x3xf32>
      %153 = arith.mulf %148, %152 : vector<14x3xf32>
      %154 = arith.truncf %153 : vector<14x3xf32> to vector<14x3xbf16>
      %c6 = arith.constant 6 : index
      %c0_119 = arith.constant 0 : index
      %c0_120 = arith.constant 0 : index
      %155 = vector.load %arg4[%c6, %c0_119, %c0_120] : memref<9x3x16xbf16, #tpu.memory_space<vmem>>, vector<1x3x16xbf16>
      %156 = vector.shape_cast %155 : vector<1x3x16xbf16> to vector<3x16xbf16>
      %cst_121 = arith.constant dense<0.000000e+00> : vector<14x16xf32>
      %157 = tpu.matmul %154, %156, %cst_121 {dimension_numbers = #tpu.dot_dimension_numbers<[1], [0], [0], [1], [0, 0, 1, 1], [], []>} : vector<14x3xbf16>, vector<3x16xbf16>, vector<14x16xf32> -> vector<14x16xf32>
      %158 = arith.addf %144, %157 : vector<14x16xf32>
      %c2_i32_122 = arith.constant 2 : i32
      %159 = arith.addi %2, %c2_i32_122 : i32
      %c0_123 = arith.constant 0 : index
      %160 = arith.index_cast %159 : i32 to index
      %c0_124 = arith.constant 0 : index
      %c0_125 = arith.constant 0 : index
      %161 = vector.load %arg3[%c0_123, %160, %c0_124, %c0_125] : memref<1x16x16x3xf32, #tpu.memory_space<vmem>>, vector<1x1x14x3xf32>
      %162 = vector.shape_cast %161 : vector<1x1x14x3xf32> to vector<14x3xf32>
      %163 = arith.truncf %162 : vector<14x3xf32> to vector<14x3xbf16>
      %c6_126 = arith.constant 6 : index
      %c0_127 = arith.constant 0 : index
      %c0_128 = arith.constant 0 : index
      %164 = vector.load %arg5[%c6_126, %c0_127, %c0_128] : memref<9x3x16xbf16, #tpu.memory_space<vmem>>, vector<1x3x16xbf16>
      %165 = vector.shape_cast %164 : vector<1x3x16xbf16> to vector<3x16xbf16>
      %cst_129 = arith.constant dense<0.000000e+00> : vector<14x16xf32>
      %166 = tpu.matmul %163, %165, %cst_129 {dimension_numbers = #tpu.dot_dimension_numbers<[1], [0], [0], [1], [0, 0, 1, 1], [], []>} : vector<14x3xbf16>, vector<3x16xbf16>, vector<14x16xf32> -> vector<14x16xf32>
      %167 = arith.addf %158, %166 : vector<14x16xf32>
      %c2_i32_130 = arith.constant 2 : i32
      %168 = arith.addi %2, %c2_i32_130 : i32
      %c0_131 = arith.constant 0 : index
      %169 = arith.index_cast %168 : i32 to index
      %c1_132 = arith.constant 1 : index
      %c0_133 = arith.constant 0 : index
      %170 = vector.load %arg1[%c0_131, %169, %c1_132, %c0_133] : memref<1x16x16x3xf32, #tpu.memory_space<vmem>>, vector<1x1x14x3xf32>
      %171 = vector.shape_cast %170 : vector<1x1x14x3xf32> to vector<14x3xf32>
      %c2_i32_134 = arith.constant 2 : i32
      %172 = arith.addi %2, %c2_i32_134 : i32
      %173 = arith.index_cast %172 : i32 to index
      %c1_135 = arith.constant 1 : index
      %c0_136 = arith.constant 0 : index
      %174 = vector.load %arg2[%173, %c1_135, %c0_136] : memref<16x16x3xf32, #tpu.memory_space<vmem>>, vector<1x14x3xf32>
      %175 = vector.shape_cast %174 : vector<1x14x3xf32> to vector<14x3xf32>
      %176 = arith.mulf %171, %175 : vector<14x3xf32>
      %177 = arith.truncf %176 : vector<14x3xf32> to vector<14x3xbf16>
      %c7 = arith.constant 7 : index
      %c0_137 = arith.constant 0 : index
      %c0_138 = arith.constant 0 : index
      %178 = vector.load %arg4[%c7, %c0_137, %c0_138] : memref<9x3x16xbf16, #tpu.memory_space<vmem>>, vector<1x3x16xbf16>
      %179 = vector.shape_cast %178 : vector<1x3x16xbf16> to vector<3x16xbf16>
      %cst_139 = arith.constant dense<0.000000e+00> : vector<14x16xf32>
      %180 = tpu.matmul %177, %179, %cst_139 {dimension_numbers = #tpu.dot_dimension_numbers<[1], [0], [0], [1], [0, 0, 1, 1], [], []>} : vector<14x3xbf16>, vector<3x16xbf16>, vector<14x16xf32> -> vector<14x16xf32>
      %181 = arith.addf %167, %180 : vector<14x16xf32>
      %c2_i32_140 = arith.constant 2 : i32
      %182 = arith.addi %2, %c2_i32_140 : i32
      %c0_141 = arith.constant 0 : index
      %183 = arith.index_cast %182 : i32 to index
      %c1_142 = arith.constant 1 : index
      %c0_143 = arith.constant 0 : index
      %184 = vector.load %arg3[%c0_141, %183, %c1_142, %c0_143] : memref<1x16x16x3xf32, #tpu.memory_space<vmem>>, vector<1x1x14x3xf32>
      %185 = vector.shape_cast %184 : vector<1x1x14x3xf32> to vector<14x3xf32>
      %186 = arith.truncf %185 : vector<14x3xf32> to vector<14x3xbf16>
      %c7_144 = arith.constant 7 : index
      %c0_145 = arith.constant 0 : index
      %c0_146 = arith.constant 0 : index
      %187 = vector.load %arg5[%c7_144, %c0_145, %c0_146] : memref<9x3x16xbf16, #tpu.memory_space<vmem>>, vector<1x3x16xbf16>
      %188 = vector.shape_cast %187 : vector<1x3x16xbf16> to vector<3x16xbf16>
      %cst_147 = arith.constant dense<0.000000e+00> : vector<14x16xf32>
      %189 = tpu.matmul %186, %188, %cst_147 {dimension_numbers = #tpu.dot_dimension_numbers<[1], [0], [0], [1], [0, 0, 1, 1], [], []>} : vector<14x3xbf16>, vector<3x16xbf16>, vector<14x16xf32> -> vector<14x16xf32>
      %190 = arith.addf %181, %189 : vector<14x16xf32>
      %c2_i32_148 = arith.constant 2 : i32
      %191 = arith.addi %2, %c2_i32_148 : i32
      %c0_149 = arith.constant 0 : index
      %192 = arith.index_cast %191 : i32 to index
      %c2_150 = arith.constant 2 : index
      %c0_151 = arith.constant 0 : index
      %193 = vector.load %arg1[%c0_149, %192, %c2_150, %c0_151] : memref<1x16x16x3xf32, #tpu.memory_space<vmem>>, vector<1x1x14x3xf32>
      %194 = vector.shape_cast %193 : vector<1x1x14x3xf32> to vector<14x3xf32>
      %c2_i32_152 = arith.constant 2 : i32
      %195 = arith.addi %2, %c2_i32_152 : i32
      %196 = arith.index_cast %195 : i32 to index
      %c2_153 = arith.constant 2 : index
      %c0_154 = arith.constant 0 : index
      %197 = vector.load %arg2[%196, %c2_153, %c0_154] : memref<16x16x3xf32, #tpu.memory_space<vmem>>, vector<1x14x3xf32>
      %198 = vector.shape_cast %197 : vector<1x14x3xf32> to vector<14x3xf32>
      %199 = arith.mulf %194, %198 : vector<14x3xf32>
      %200 = arith.truncf %199 : vector<14x3xf32> to vector<14x3xbf16>
      %c8 = arith.constant 8 : index
      %c0_155 = arith.constant 0 : index
      %c0_156 = arith.constant 0 : index
      %201 = vector.load %arg4[%c8, %c0_155, %c0_156] : memref<9x3x16xbf16, #tpu.memory_space<vmem>>, vector<1x3x16xbf16>
      %202 = vector.shape_cast %201 : vector<1x3x16xbf16> to vector<3x16xbf16>
      %cst_157 = arith.constant dense<0.000000e+00> : vector<14x16xf32>
      %203 = tpu.matmul %200, %202, %cst_157 {dimension_numbers = #tpu.dot_dimension_numbers<[1], [0], [0], [1], [0, 0, 1, 1], [], []>} : vector<14x3xbf16>, vector<3x16xbf16>, vector<14x16xf32> -> vector<14x16xf32>
      %204 = arith.addf %190, %203 : vector<14x16xf32>
      %c2_i32_158 = arith.constant 2 : i32
      %205 = arith.addi %2, %c2_i32_158 : i32
      %c0_159 = arith.constant 0 : index
      %206 = arith.index_cast %205 : i32 to index
      %c2_160 = arith.constant 2 : index
      %c0_161 = arith.constant 0 : index
      %207 = vector.load %arg3[%c0_159, %206, %c2_160, %c0_161] : memref<1x16x16x3xf32, #tpu.memory_space<vmem>>, vector<1x1x14x3xf32>
      %208 = vector.shape_cast %207 : vector<1x1x14x3xf32> to vector<14x3xf32>
      %209 = arith.truncf %208 : vector<14x3xf32> to vector<14x3xbf16>
      %c8_162 = arith.constant 8 : index
      %c0_163 = arith.constant 0 : index
      %c0_164 = arith.constant 0 : index
      %210 = vector.load %arg5[%c8_162, %c0_163, %c0_164] : memref<9x3x16xbf16, #tpu.memory_space<vmem>>, vector<1x3x16xbf16>
      %211 = vector.shape_cast %210 : vector<1x3x16xbf16> to vector<3x16xbf16>
      %cst_165 = arith.constant dense<0.000000e+00> : vector<14x16xf32>
      %212 = tpu.matmul %209, %211, %cst_165 {dimension_numbers = #tpu.dot_dimension_numbers<[1], [0], [0], [1], [0, 0, 1, 1], [], []>} : vector<14x3xbf16>, vector<3x16xbf16>, vector<14x16xf32> -> vector<14x16xf32>
      %213 = arith.addf %204, %212 : vector<14x16xf32>
      %cst_166 = arith.constant 0.000000e+00 : f32
      %214 = vector.broadcast %cst_166 : f32 to vector<14x16xf32>
      %215 = arith.maximumf %213, %214 : vector<14x16xf32>
      %216 = arith.truncf %215 : vector<14x16xf32> to vector<14x16xbf16>
      %c0_167 = arith.constant 0 : index
      %c0_168 = arith.constant 0 : index
      %217 = vector.load %arg7[%c0_167, %c0_168] : memref<16x3xbf16, #tpu.memory_space<vmem>>, vector<16x3xbf16>
      %cst_169 = arith.constant dense<0.000000e+00> : vector<14x3xf32>
      %218 = tpu.matmul %216, %217, %cst_169 {dimension_numbers = #tpu.dot_dimension_numbers<[1], [0], [0], [1], [0, 0, 1, 1], [], []>} : vector<14x16xbf16>, vector<16x3xbf16>, vector<14x3xf32> -> vector<14x3xf32>
      %c0_170 = arith.constant 0 : index
      %c0_171 = arith.constant 0 : index
      %219 = vector.load %arg8[%c0_170, %c0_171] : memref<1x3xf32, #tpu.memory_space<vmem>>, vector<1x3xf32>
      %220 = vector.broadcast %219 : vector<1x3xf32> to vector<14x3xf32>
      %221 = arith.addf %218, %220 : vector<14x3xf32>
      %c0_172 = arith.constant 0 : index
      %222 = arith.index_cast %2 : i32 to index
      %c0_173 = arith.constant 0 : index
      %c0_174 = arith.constant 0 : index
      %223 = vector.load %arg9[%c0_172, %222, %c0_173, %c0_174] : memref<1x14x14x3xf32, #tpu.memory_space<vmem>>, vector<1x1x14x3xf32>
      %224 = vector.shape_cast %223 : vector<1x1x14x3xf32> to vector<14x3xf32>
      %225 = vector.shape_cast %221 : vector<14x3xf32> to vector<1x1x14x3xf32>
      tpu.vector_store %arg9[%c0_172, %222, %c0_173, %c0_174], %225 {strides = array<i32>} : memref<1x14x14x3xf32, #tpu.memory_space<vmem>>, vector<1x1x14x3xf32>,
    }
    %c14_i32_0 = arith.constant 14 : i32
    return
  }
  func.func @transform_0(%arg0: i32) -> (i32, i32, i32, i32) {
    %c0_i32 = arith.constant 0 : i32
    %c0_i32_0 = arith.constant 0 : i32
    %c0_i32_1 = arith.constant 0 : i32
    %c0_i32_2 = arith.constant 0 : i32
    return %arg0, %c0_i32, %c0_i32_0, %c0_i32_1 : i32, i32, i32, i32
  }
  func.func @transform_1(%arg0: i32) -> (i32, i32, i32) {
    %c0_i32 = arith.constant 0 : i32
    %c0_i32_0 = arith.constant 0 : i32
    %c0_i32_1 = arith.constant 0 : i32
    %c0_i32_2 = arith.constant 0 : i32
    return %c0_i32, %c0_i32_0, %c0_i32_1 : i32, i32, i32
  }
  func.func @transform_2(%arg0: i32) -> (i32, i32, i32, i32) {
    %c0_i32 = arith.constant 0 : i32
    %c0_i32_0 = arith.constant 0 : i32
    %c0_i32_1 = arith.constant 0 : i32
    %c0_i32_2 = arith.constant 0 : i32
    return %arg0, %c0_i32, %c0_i32_0, %c0_i32_1 : i32, i32, i32, i32
  }
  func.func @transform_3(%arg0: i32) -> (i32, i32, i32) {
    %c0_i32 = arith.constant 0 : i32
    %c0_i32_0 = arith.constant 0 : i32
    %c0_i32_1 = arith.constant 0 : i32
    %c0_i32_2 = arith.constant 0 : i32
    return %c0_i32, %c0_i32_0, %c0_i32_1 : i32, i32, i32
  }
  func.func @transform_4(%arg0: i32) -> (i32, i32, i32) {
    %c0_i32 = arith.constant 0 : i32
    %c0_i32_0 = arith.constant 0 : i32
    %c0_i32_1 = arith.constant 0 : i32
    %c0_i32_2 = arith.constant 0 : i32
    return %c0_i32, %c0_i32_0, %c0_i32_1 : i32, i32, i32
  }
  func.func @transform_5(%arg0: i32) -> (i32, i32) {
    %c0_i32 = arith.constant 0 : i32
    %c0_i32_0 = arith.constant 0 : i32
    %c0_i32_1 = arith.constant 0 : i32
    return %c0_i32, %c0_i32_0 : i32, i32
  }
  func.func @transform_6(%arg0: i32) -> (i32, i32) {
    %c0_i32 = arith.constant 0 : i32
    %c0_i32_0 = arith.constant 0 : i32
    %c0_i32_1 = arith.constant 0 : i32
    return %c0_i32, %c0_i32_0 : i32, i32
  }
  func.func @transform_7(%arg0: i32) -> (i32, i32) {
    %c0_i32 = arith.constant 0 : i32
    %c0_i32_0 = arith.constant 0 : i32
    %c0_i32_1 = arith.constant 0 : i32
    return %c0_i32, %c0_i32_0 : i32, i32
  }
  func.func @transform_8(%arg0: i32) -> (i32, i32, i32, i32) {
    %c0_i32 = arith.constant 0 : i32
    %c0_i32_0 = arith.constant 0 : i32
    %c0_i32_1 = arith.constant 0 : i32
    %c0_i32_2 = arith.constant 0 : i32
    return %arg0, %c0_i32, %c0_i32_0, %c0_i32_1 : i32, i32, i32, i32
  }
}

</mosaic_0001>

<bundles_post_ra>
// kernel: tile.8
= control target key start
LH: loop header
LB: loop body
LE: loop exit
PB: predicated region body
PF: predicated region fallthrough
CT: control target
= control target key end

     0   :  { %s22_s0 = inlined_call_operand.vmem [shape: f32[3], index: 0, kind: input, shape index: {}]   ;;  %s23_s1 = inlined_call_operand.vmem [shape: f32[4,3], index: 1, kind: output, shape index: {}]  }
   0x1   :  { %v4_v0 = vld [vmem:[%s22_s0] ss:$0 sm:$0xff] }
   0x2   :  { %5 = vst [vmem:[%s23_s1] sm:$0xf] %v4_v0 }

// kernel: bayer_network_forward.3
= control target key start
LH: loop header
LB: loop body
LE: loop exit
PB: predicated region body
PF: predicated region fallthrough
CT: control target
= control target key end

     0   :  { %s1042_s12 = smov 0   ;;  %s1173_s0 = inlined_call_operand.vmem [shape: f32[2,12,12,12], index: 0, kind: input, shape index: {}]   ;;  %s1174_s1 = inlined_call_operand.vmem [shape: bf16[9,12,16], index: 1, kind: input, shape index: {}]   ;;  %s1175_s2 = inlined_call_operand.vmem [shape: f32[1,16], index: 2, kind: input, shape index: {}]   ;;  %s1176_s3 = inlined_call_operand.vmem [shape: f32[2,10,10,16], index: 3, kind: output, shape index: {}]  }
   0x1 LB: > { %s812_s13 = sadd.s32 4294967295, %s1014_s12   ;;  %p816_p0 = scmp.ge.s32.totalorder %s1014_s12, 1  ;;  %s1014_s12 = sphi %s1042_s12, %s13_s12  }
   0x2   : > { %p137_p1 = scmp.lt.s32.totalorder %s1014_s12, 3 }
   0x4   : > { %p138_p2 = pnand %p816_p0, %p137_p1 }
   0x5   : > { %p161_p3 = scmp.lt.s32.totalorder (!%p138_p2), %s812_s13, 1  ;;  %s1060_s22 = smov (!%p138_p2), 0  }
   0x6   : > { %141 = sbr.rel (%p138_p2) target bundleno = 291 (0x123), region = 32 }
   0xd   : > { %s1178_s13 = smov (!%p161_p3, %s812_s13), 1 }
   0xe   : > { %s975_s14 = smul.u32 192, %s1178_s13 }
   0xf   : > { %s976_s15 = smul.u32 160, %s1178_s13 }
  0x10   : > { %s1053_s18 = scalar_lea.vmem %s1173_s0, %s975_s14 }
  0x11   : > { %s1058_s21 = scalar_lea.vmem %s1176_s3, %s976_s15 }
  0x12 LB: >> { %vm202_vm0 = vcmask 1045504   ;;  %v1020_v0 = vmov 0.0   ;;  %v995_v1 = vld [vmem:[%s1174_s1] sm:$0x3f]   ;;  %s820_s27 = sshll.u32 %s1018_s22, 4  ;;  %vm1021_vm1 = vmmov 0   ;;  %s1018_s22 = sphi %s1060_s22, %s177_s22  }
  0x13   : >> { %889 = vmatprep.subr.bf16.mxu1 %v1020_v0  ;;  %913 = vmatprep.subr.bf16.mxu0 %v1020_v0  ;;  %v996_v2 = vld [vmem:[%s1174_s1 + $0x20] sm:$0x3f]   ;;  %v204_v3 = vsel %vm202_vm0, %v995_v1, 0  ;;  %s1082_s28 = scalar_lea.vmem %s1053_s18, %s820_s27  ;;  %vm198_vm2 = vcmask 97280   ;;  %v997_v10 = vld [vmem:[%s1174_s1 + $0x28] sm:$0x3f]   ;;  %s737_s20 = scalar_lea.vmem %s1058_s21, %s820_s27 }
  0x14   : >> { %891 = vmatprep.mubr.msk.bf16.mxu1 %vm1021_vm1, %v1020_v0  ;;  %915 = vmatprep.mubr.msk.bf16.mxu0 %vm1021_vm1, %v1020_v0  ;;  %v447_v4 = vsel %vm202_vm0, %v996_v2, 0  ;;  %v188_v5 = vld [vmem:[%s1082_s28] sm:$0xff]  ;;  %v189_v6 = vld [vmem:[%s1082_s28 + $0x8] sm:$0x3]  ;;  %v838_v7 = vld [vmem:[%s1082_s28 + $0x11] sm:$0xff]  ;;  %v507_v13 = vsel %vm202_vm0, %v997_v10, 0 }
  0x15   : >> { %890 = vmatpush3.bf16.msra.mxu1 %v204_v3  ;;  %914 = vmatpush3.bf16.msra.mxu0 %v447_v4  ;;  %v190_v8 = vpack.c.bf16 %v189_v6, %v188_v5  ;;  %v839_v9 = vld [vmem:[%s1082_s28 + $0x19] sm:$0x3]  ;;  %v998_v12 = vld [vmem:[%s1174_s1 + $0x8] sm:$0x3f]   ;;  %v1000_v19 = vld [vmem:[%s1174_s1 + $0x10] sm:$0x3f]  }
  0x16   : >> { %895 = vmatprep.subr.bf16.mxu1 %v1020_v0  ;;  %v434_v11 = vpack.c.bf16 %v839_v9, %v838_v7  ;;  %919 = vmatprep.subr.bf16.mxu0 %v1020_v0  ;;  %v264_v14 = vsel %vm202_vm0, %v998_v12, 0  ;;  %v249_v15 = vld [vmem:[%s1082_s28 + $0x1] sm:$0xff]  ;;  %v250_v16 = vld [vmem:[%s1082_s28 + $0x9] sm:$0x3]  ;;  %v844_v17 = vld [vmem:[%s1082_s28 + $0x12] sm:$0xff]  ;;  %v324_v23 = vsel %vm202_vm0, %v1000_v19, 0 }
  0x17   : >> { %v845_v18 = vld [vmem:[%s1082_s28 + $0x1a] sm:$0x3]  ;;  %v999_v20 = vld [vmem:[%s1174_s1 + $0x30] sm:$0x3f]   ;;  %v251_v21 = vpack.c.bf16 %v250_v16, %v249_v15  ;;  %v309_v25 = vld [vmem:[%s1082_s28 + $0x2] sm:$0xff]  ;;  %vm738_vm3 = vcmask 130048  }
  0x18   : >> { %892 = vmatmul.mubr.msk.bf16.vlgmr.msra.gmra.mrb[0].mxu1 %vm198_vm2, %v190_v8  ;;  %916 = vmatmul.mubr.msk.bf16.vlgmr.msra.gmra.mrb[0].mxu0 %vm198_vm2, %v434_v11  ;;  %v494_v22 = vpack.c.bf16 %v845_v18, %v844_v17  ;;  %v570_v24 = vsel %vm202_vm0, %v999_v20, 0  ;;  %v310_v26 = vld [vmem:[%s1082_s28 + $0xa] sm:$0x3]  ;;  %v851_v27 = vld [vmem:[%s1082_s28 + $0x20] sm:$0xff]  ;;  %v852_v28 = vld [vmem:[%s1082_s28 + $0x28] sm:$0x3] }
  0x19   : >> { %897 = vmatprep.mubr.msk.bf16.mxu1 %vm1021_vm1, %v1020_v0  ;;  %920 = vmatpush3.bf16.msra.mxu0 %v507_v13  ;;  %v1002_v29 = vld [vmem:[%s1174_s1 + $0x18] sm:$0x3f]   ;;  %v311_v31 = vpack.c.bf16 %v310_v26, %v309_v25  ;;  %v557_v32 = vpack.c.bf16 %v852_v28, %v851_v27  ;;  %v832_v35 = vld [vmem:[%s1082_s28 + $0x10] sm:$0xff]  ;;  %v857_v37 = vld [vmem:[%s1082_s28 + $0x21] sm:$0xff]  ;;  %vm740_vm4 = vcmask 123904   ;;  %s177_s22 = sadd.s32 1, %s1018_s22  }
  0x1a   : >> { %896 = vmatpush3.bf16.msra.mxu1 %v264_v14  ;;  %921 = vmatprep.mubr.msk.bf16.mxu0 %vm1021_vm1, %v1020_v0  ;;  %v1001_v30 = vld [vmem:[%s1174_s1 + $0x38] sm:$0x3f]   ;;  %v387_v33 = vsel %vm202_vm0, %v1002_v29, 0  ;;  %v858_v38 = vld [vmem:[%s1082_s28 + $0x29] sm:$0x3]  ;;  %p174_p4 = scmp.ge.s32.totalorder %s177_s22, 10  }
  0x1b   : >> { %925 = vmatprep.subr.bf16.mxu0 %v1020_v0  ;;  %901 = vmatprep.subr.bf16.mxu1 %v1020_v0  ;;  %v630_v34 = vsel %vm202_vm0, %v1001_v30, 0  ;;  %v833_v36 = vld [vmem:[%s1082_s28 + $0x18] sm:$0x3]  ;;  %v1003_v39 = vld [vmem:[%s1174_s1 + $0x40] sm:$0x3f]   ;;  %v617_v41 = vpack.c.bf16 %v858_v38, %v857_v37 }
  0x1c   : >> { %v374_v40 = vpack.c.bf16 %v833_v36, %v832_v35  ;;  %v690_v42 = vsel %vm202_vm0, %v1003_v39, 0  ;;  %v863_v43 = vld [vmem:[%s1082_s28 + $0x22] sm:$0xff]  ;;  %v864_v44 = vld [vmem:[%s1082_s28 + $0x2a] sm:$0x3]  ;;  %v819_v50 = vld [vmem:[%s1175_s2] ss:$0 sm:$0xff] }
  0x1d   : >> { %v677_v45 = vpack.c.bf16 %v864_v44, %v863_v43 }
  0x24   : >> { %898 = vmatmul.mubr.msk.bf16.vlgmr.msra.gmra.mrb[0].mxu1 %vm198_vm2, %v251_v21  ;;  %922 = vmatmul.mubr.msk.bf16.vlgmr.msra.gmra.mrb[0].mxu0 %vm198_vm2, %v494_v22 }
  0x25   : >> { %902 = vmatpush3.bf16.msra.mxu1 %v324_v23  ;;  %926 = vmatpush3.bf16.msra.mxu0 %v570_v24 }
  0x26   : >> { %903 = vmatprep.mubr.msk.bf16.mxu1 %vm1021_vm1, %v1020_v0  ;;  %927 = vmatprep.mubr.msk.bf16.mxu0 %vm1021_vm1, %v1020_v0 }
  0x27   : >> { %931 = vmatprep.subr.bf16.mxu0 %v1020_v0  ;;  %907 = vmatprep.subr.bf16.mxu1 %v1020_v0 }
  0x30   : >> { %904 = vmatmul.mubr.msk.bf16.vlgmr.msra.gmra.mrb[0].mxu1 %vm198_vm2, %v311_v31  ;;  %928 = vmatmul.mubr.msk.bf16.vlgmr.msra.gmra.mrb[0].mxu0 %vm198_vm2, %v557_v32 }
  0x31   : >> { %908 = vmatpush3.bf16.msra.mxu1 %v387_v33  ;;  %932 = vmatpush3.bf16.msra.mxu0 %v630_v34 }
  0x32   : >> { %909 = vmatprep.mubr.msk.bf16.mxu1 %vm1021_vm1, %v1020_v0  ;;  %933 = vmatprep.mubr.msk.bf16.mxu0 %vm1021_vm1, %v1020_v0 }
  0x33   : >> { %937 = vmatprep.subr.bf16.mxu0 %v1020_v0 }
  0x3c   : >> { %910 = vmatmul.mubr.msk.bf16.vlgmr.msra.gmra.mrb[0].mxu1 %vm198_vm2, %v374_v40  ;;  %934 = vmatmul.mubr.msk.bf16.vlgmr.msra.gmra.mrb[0].mxu0 %vm198_vm2, %v617_v41 }
  0x3d   : >> { %938 = vmatpush3.bf16.msra.mxu0 %v690_v42  ;;  %939 = vmatprep.mubr.msk.bf16.mxu0 %vm1021_vm1, %v1020_v0 }
  0x48   : >> { %940 = vmatmul.mubr.msk.bf16.vlgmr.msra.gmra.mrb[0].mxu0 %vm198_vm2, %v677_v45 }
 0x10f   : >> { %v423_v46 = vpop.f32.mrb[0].mxu1 }
 0x110   : >> { %v911_v47 = vpop.f32.mrb[1].mxu1  ;;  %v943_v51 = vadd.f32 %v819_v50, %v423_v46 }
 0x111   : >> { %v426_v48 = vpop.f32.mrb[2].mxu1 }
 0x112   : >> { %v912_v49 = vpop.f32.mrb[3].mxu1  ;;  %v945_v53 = vadd.f32 %v819_v50, %v426_v48 }
 0x11b   : >> { %v726_v52 = vpop.f32.mrb[0].mxu0 }
 0x11c   : >> { %v944_v54 = vadd.f32 %v943_v51, %v726_v52  ;;  %v941_v55 = vpop.f32.mrb[1].mxu0  ;;  %176 = sbr.rel (!%p174_p4) target bundleno = 18 (0x12), region = 81 }
 0x11d   : >> { %v729_v56 = vpop.f32.mrb[2].mxu0 }
 0x11e   : >> { %v735_v57 = vmax.f32 %v944_v54, 0.0  ;;  %v946_v58 = vadd.f32 %v945_v53, %v729_v56  ;;  %v942_v59 = vpop.f32.mrb[3].mxu0 }
 0x120   : >> { %739 = vst.msk [vmem:[%s737_s20] sm:$0xff] %vm738_vm3, %v735_v57  ;;  %v736_v60 = vmax.f32 %v946_v58, 0.0 }
 0x122   : >> { %741 = vst.msk [vmem:[%s737_s20 + $0x8] sm:$0x3] %vm740_vm4, %v736_v60 }
 0x123 PF: > { %s13_s12 = sadd.s32 1, %s1014_s12  }
 0x124   : > { %p10_p5 = scmp.ge.s32.totalorder %s13_s12, 4  }
 0x126   :  { %12 = sbr.rel (!%p10_p5) target bundleno = 1 (0x1), region = 92 }

// kernel: bayer_network_forward.4
= control target key start
LH: loop header
LB: loop body
LE: loop exit
PB: predicated region body
PF: predicated region fallthrough
CT: control target
= control target key end

     0   :  { %s1130_s18 = smov 0   ;;  %s1250_s0 = inlined_call_operand.vmem [shape: f32[2,10,10,16], index: 0, kind: input, shape index: {}]   ;;  %s1251_s1 = inlined_call_operand.vmem [shape: bf16[9,16,32], index: 1, kind: input, shape index: {}]   ;;  %s1252_s2 = inlined_call_operand.vmem [shape: f32[1,32], index: 2, kind: input, shape index: {}]   ;;  %s1253_s3 = inlined_call_operand.vmem [shape: bf16[16,12], index: 3, kind: input, shape index: {}]   ;;  %s1254_s4 = inlined_call_operand.vmem [shape: f32[1,12], index: 4, kind: input, shape index: {}]   ;;  %s1255_s5 = inlined_call_operand.vmem [shape: f32[2,8,8,12], index: 5, kind: output, shape index: {}]  }
   0x1 LB: > { %s882_s19 = sadd.s32 4294967295, %s1091_s18   ;;  %p886_p0 = scmp.ge.s32.totalorder %s1091_s18, 1  ;;  %s1091_s18 = sphi %s1130_s18, %s15_s18  }
   0x2   : > { %p187_p1 = scmp.lt.s32.totalorder %s1091_s18, 3 }
   0x4   : > { %p188_p2 = pnand %p886_p0, %p187_p1 }
   0x5   : > { %p215_p3 = scmp.lt.s32.totalorder (!%p188_p2), %s882_s19, 1  ;;  %s1148_s28 = smov (!%p188_p2), 0  }
   0x6   : > { %191 = sbr.rel (%p188_p2) target bundleno = 620 (0x26c), region = 40 }
   0xd   : > { %s1257_s19 = smov (!%p215_p3, %s882_s19), 1 }
   0xe   : > { %s1051_s20 = smul.u32 160, %s1257_s19  ;;  %s940_s21 = sshll.u32 %s1257_s19, 6 }
   0xf   : > { %s1141_s24 = scalar_lea.vmem %s1255_s5, %s940_s21 }
  0x10   : > { %s1146_s27 = scalar_lea.vmem %s1250_s0, %s1051_s20 }
  0x11 LB: >> { %v1071_v0 = vld [vmem:[%s1251_s1 + $0x20] sm:$0xff]   ;;  %v1097_v1 = vmov 0.0   ;;  %vm1098_vm0 = vmmov 0   ;;  %s891_s8 = sshll.u32 %s1095_s28, 4  ;;  %v1073_v3 = vld [vmem:[%s1251_s1 + $0x28] sm:$0xff]   ;;  %vm252_vm1 = vcmask 130048   ;;  %s1095_s28 = sphi %s1148_s28, %s231_s28  }
  0x12   : >> { %985 = vmatprep.subr.bf16.mxu0 %v1097_v1  ;;  %961 = vmatprep.subr.bf16.mxu1 %v1097_v1  ;;  %v1072_v2 = vld [vmem:[%s1251_s1] sm:$0xff]   ;;  %s1167_s9 = scalar_lea.vmem %s1146_s27, %s891_s8  ;;  %v1074_v6 = vld [vmem:[%s1251_s1 + $0x8] sm:$0xff]   ;;  %v1075_v13 = vld [vmem:[%s1251_s1 + $0x30] sm:$0xff]   ;;  %s1099_s7 = smov 112   ;;  %vm810_vm2 = vcmask 97280  }
  0x13   : >> { %986 = vmatpush3.bf16.msra.mxu0 %v1071_v0  ;;  %963 = vmatprep.mubr.msk.bf16.mxu1 %vm1098_vm0, %v1097_v1  ;;  %v242_v4 = vld [vmem:[%s1167_s9] sm:$0xff]  ;;  %v908_v5 = vld [vmem:[%s1167_s9 + $0x11] sm:$0xff]  ;;  %s937_s8 = sshll.u32 %s1095_s28, 3  ;;  %s231_s28 = sadd.s32 1, %s1095_s28  }
  0x14   : >> { %962 = vmatpush3.bf16.msra.mxu1 %v1072_v2  ;;  %987 = vmatprep.mubr.msk.bf16.mxu0 %vm1098_vm0, %v1097_v1  ;;  %v243_v7 = vpack.c.bf16 %v242_v4, %v242_v4  ;;  %v466_v8 = vpack.c.bf16 %v908_v5, %v908_v5  ;;  %v297_v9 = vld [vmem:[%s1167_s9 + $0x1] sm:$0xff]  ;;  %v913_v10 = vld [vmem:[%s1167_s9 + $0x12] sm:$0xff]  ;;  %v890_v33 = vld [vmem:[%s1252_s2] ss:$0 sm:$0xff]  ;;  %s809_s11 = scalar_lea.vmem %s1141_s24, %s937_s8  ;;  %p228_p4 = scmp.ge.s32.totalorder %s231_s28, 8  }
  0x15   : >> { %991 = vmatprep.subr.bf16.mxu0 %v1097_v1  ;;  %967 = vmatprep.subr.bf16.mxu1 %v1097_v1  ;;  %v298_v11 = vpack.c.bf16 %v297_v9, %v297_v9  ;;  %v521_v12 = vpack.c.bf16 %v913_v10, %v913_v10  ;;  %v1076_v14 = vld [vmem:[%s1251_s1 + $0x10] sm:$0xff]   ;;  %v352_v15 = vld [vmem:[%s1167_s9 + $0x2] sm:$0xff]  ;;  %v1077_v19 = vld [vmem:[%s1251_s1 + $0x38] sm:$0xff]  }
  0x16   : >> { %988 = vmatmul.mubr.msk.bf16.vlgmr.msra.gmra.mrb[0].mxu0 %vm252_vm1, %v466_v8  ;;  %v919_v16 = vld [vmem:[%s1167_s9 + $0x20] sm:$0xff]  ;;  %v353_v17 = vpack.c.bf16 %v352_v15, %v352_v15  ;;  %v1078_v20 = vld [vmem:[%s1251_s1 + $0x18] sm:$0xff]   ;;  %v903_v21 = vld [vmem:[%s1167_s9 + $0x10] sm:$0xff] }
  0x17   : >> { %964 = vmatmul.mubr.msk.bf16.vlgmr.msra.gmra.mrb[0].mxu1 %vm252_vm1, %v243_v7  ;;  %992 = vmatpush3.bf16.msra.mxu0 %v1073_v3  ;;  %v579_v18 = vpack.c.bf16 %v919_v16, %v919_v16  ;;  %v924_v22 = vld [vmem:[%s1167_s9 + $0x21] sm:$0xff]  ;;  %v411_v23 = vpack.c.bf16 %v903_v21, %v903_v21  ;;  %v934_v44 = vld [vmem:[%s1254_s4] ss:$0 sm:$0xff] }
  0x18   : >> { %968 = vmatpush3.bf16.msra.mxu1 %v1074_v6  ;;  %969 = vmatprep.mubr.msk.bf16.mxu1 %vm1098_vm0, %v1097_v1  ;;  %v634_v24 = vpack.c.bf16 %v924_v22, %v924_v22  ;;  %v1079_v25 = vld [vmem:[%s1251_s1 + $0x40] sm:$0xff]  }
  0x19   : >> { %993 = vmatprep.mubr.msk.bf16.mxu0 %vm1098_vm0, %v1097_v1  ;;  %997 = vmatprep.subr.bf16.mxu0 %v1097_v1  ;;  %v929_v26 = vld [vmem:[%s1167_s9 + $0x22] sm:$0xff] }
  0x1a   : >> { %973 = vmatprep.subr.bf16.mxu1 %v1097_v1  ;;  %v689_v27 = vpack.c.bf16 %v929_v26, %v929_v26  ;;  %v1080_v28 = vld [vmem:[%s1253_s3] sm:$0xff]  }
  0x22   : >> { %994 = vmatmul.mubr.msk.bf16.vlgmr.msra.gmra.mrb[0].mxu0 %vm252_vm1, %v521_v12 }
  0x23   : >> { %970 = vmatmul.mubr.msk.bf16.vlgmr.msra.gmra.mrb[0].mxu1 %vm252_vm1, %v298_v11  ;;  %998 = vmatpush3.bf16.msra.mxu0 %v1075_v13 }
  0x24   : >> { %974 = vmatpush3.bf16.msra.mxu1 %v1076_v14  ;;  %975 = vmatprep.mubr.msk.bf16.mxu1 %vm1098_vm0, %v1097_v1 }
  0x25   : >> { %999 = vmatprep.mubr.msk.bf16.mxu0 %vm1098_vm0, %v1097_v1  ;;  %1003 = vmatprep.subr.bf16.mxu0 %v1097_v1 }
  0x26   : >> { %979 = vmatprep.subr.bf16.mxu1 %v1097_v1 }
  0x2e   : >> { %1000 = vmatmul.mubr.msk.bf16.vlgmr.msra.gmra.mrb[0].mxu0 %vm252_vm1, %v579_v18 }
  0x2f   : >> { %976 = vmatmul.mubr.msk.bf16.vlgmr.msra.gmra.mrb[0].mxu1 %vm252_vm1, %v353_v17  ;;  %1004 = vmatpush3.bf16.msra.mxu0 %v1077_v19 }
  0x30   : >> { %980 = vmatpush3.bf16.msra.mxu1 %v1078_v20  ;;  %981 = vmatprep.mubr.msk.bf16.mxu1 %vm1098_vm0, %v1097_v1 }
  0x31   : >> { %1005 = vmatprep.mubr.msk.bf16.mxu0 %vm1098_vm0, %v1097_v1  ;;  %1009 = vmatprep.subr.bf16.mxu0 %v1097_v1 }
  0x32   : >> { %1015 = vmatprep.subr.bf16.mxu1 %v1097_v1 }
  0x3a   : >> { %1006 = vmatmul.mubr.msk.bf16.vlgmr.msra.gmra.mrb[0].mxu0 %vm252_vm1, %v634_v24 }
  0x3b   : >> { %982 = vmatmul.mubr.msk.bf16.vlgmr.msra.gmra.mrb[0].mxu1 %vm252_vm1, %v411_v23  ;;  %1010 = vmatpush3.bf16.msra.mxu0 %v1079_v25 }
  0x3c   : >> { %1011 = vmatprep.mubr.msk.bf16.mxu0 %vm1098_vm0, %v1097_v1  ;;  %1017 = vmatprep.mubr.msk.bf16.mxu1 %vm1098_vm0, %v1097_v1 }
  0x3d   : >> { %1016 = vmatpush3.bf16.msra.mxu1 %v1080_v28 }
  0x46   : >> { %1012 = vmatmul.mubr.msk.bf16.vlgmr.msra.gmra.mrb[0].mxu0 %vm252_vm1, %v689_v27 }
 0x10e   : >> { %v458_v29 = vpop.f32.mrb[0].mxu1 }
 0x10f   : >> { %v983_v30 = vpop.f32.mrb[1].mxu1  ;;  %v1021_v34 = vadd.f32 %v890_v33, %v458_v29 }
 0x110   : >> { %v461_v31 = vpop.f32.mrb[2].mxu1 }
 0x111   : >> { %v984_v32 = vpop.f32.mrb[3].mxu1 }
 0x119   : >> { %v736_v35 = vpop.f32.mrb[0].mxu0 }
 0x11a   : >> { %v1022_v36 = vadd.f32 %v1021_v34, %v736_v35  ;;  %v1013_v37 = vpop.f32.mrb[1].mxu0 }
 0x11b   : >> { %v739_v38 = vpop.f32.mrb[2].mxu0 }
 0x11c   : >> { %v743_v39 = vmax.f32 %v1022_v36, 0.0  ;;  %v1014_v40 = vpop.f32.mrb[3].mxu0 }
 0x11e   : >> { %745 = vrot.lane.b32.xlu0 %v743_v39, %s1099_s7 }
 0x190   : >> { %v746_v41 = vpop.permute.xlu0 %745 }
 0x191   : >> { %v748_v42 = vmul.f32 %v746_v41, %v743_v39 }
 0x193   : >> { %v749_v43 = vpack.c.bf16 %v748_v42, %v748_v42 }
 0x195   : >> { %1018 = vmatmul.mubr.msk.bf16.vlgmr.msra.gmra.mrb[4].mxu1 %vm252_vm1, %v749_v43 }
 0x265   : > { %230 = sbr.rel (!%p228_p4) target bundleno = 17 (0x11), region = 89 }
 0x268   : >> { %v802_v45 = vpop.f32.mrb[4].mxu1 }
 0x269   : >> { %v803_v46 = vadd.f32 %v934_v44, %v802_v45  ;;  %v1019_v47 = vpop.f32.mrb[5].mxu1 }
 0x26a   : >> { %v805_v48 = vpop.f32.mrb[6].mxu1 }
 0x26b   : >> { %811 = vst.msk [vmem:[%s809_s11] sm:$0xff] %vm810_vm2, %v803_v46  ;;  %v1020_v49 = vpop.f32.mrb[7].mxu1 }
 0x26c PF: > { %s15_s18 = sadd.s32 1, %s1091_s18  }
 0x26d   : > { %p12_p5 = scmp.ge.s32.totalorder %s15_s18, 4  }
 0x26f   :  { %14 = sbr.rel (!%p12_p5) target bundleno = 1 (0x1), region = 100 }

// kernel: bayer_network_forward.5
= control target key start
LH: loop header
LB: loop body
LE: loop exit
PB: predicated region body
PF: predicated region fallthrough
CT: control target
= control target key end

     0   :  { %s1931_s27 = smov 0   ;;  %s2224_s0 = inlined_call_operand.vmem [shape: f32[2,16,16,3], index: 0, kind: input, shape index: {}]   ;;  %s2225_s1 = inlined_call_operand.vmem [shape: f32[16,16,3], index: 1, kind: input, shape index: {}]   ;;  %s2226_s2 = inlined_call_operand.vmem [shape: f32[2,16,16,3], index: 2, kind: input, shape index: {}]   ;;  %s2227_s3 = inlined_call_operand.vmem [shape: bf16[9,3,16], index: 3, kind: input, shape index: {}]   ;;  %s2228_s4 = inlined_call_operand.vmem [shape: bf16[9,3,16], index: 4, kind: input, shape index: {}]   ;;  %s2229_s5 = inlined_call_operand.vmem [shape: f32[1,16], index: 5, kind: input, shape index: {}]   ;;  %s2230_s6 = inlined_call_operand.vmem [shape: bf16[16,3], index: 6, kind: input, shape index: {}]   ;;  %s2231_s7 = inlined_call_operand.vmem [shape: f32[1,3], index: 7, kind: input, shape index: {}]   ;;  %s2232_s8 = inlined_call_operand.vmem [shape: f32[2,14,14,3], index: 8, kind: output, shape index: {}]  }
   0x1 LB: > { %s1531_s28 = sadd.s32 4294967295, %s1877_s27   ;;  %p1535_p0 = scmp.ge.s32.totalorder %s1877_s27, 1  ;;  %s1877_s27 = sphi %s1931_s27, %s18_s27  }
   0x2   : > { %p272_p1 = scmp.lt.s32.totalorder %s1877_s27, 3 }
   0x4   : > { %p273_p2 = pnand %p1535_p0, %p272_p1 }
   0x5   : > { %p311_p3 = scmp.lt.s32.totalorder (!%p273_p2), %s1531_s28, 1  ;;  %s1954_s18 = smov (!%p273_p2), 0  }
   0x6   : > { %276 = sbr.rel (%p273_p2) target bundleno = 572 (0x23c), region = 52 }
   0xd   : > { %s2234_s28 = smov (!%p311_p3, %s1531_s28), 1 }
   0xe   : > { %s1624_s29 = sshll.u32 %s2234_s28, 8  ;;  %s1846_s30 = smul.u32 224, %s2234_s28 }
   0xf   : > { %s1942_s11 = scalar_lea.vmem %s2224_s0, %s1624_s29  ;;  %s1947_s14 = scalar_lea.vmem %s2226_s2, %s1624_s29 }
  0x10   : > { %s1952_s17 = scalar_lea.vmem %s2232_s8, %s1846_s30 }
  0x11 LB: >> { %vm356_vm0 = vcmask 1040384   ;;  %vm357_vm1 = vcmask 1041408   ;;  %v1570_v0 = vld [vmem:[%s2227_s3 + $0x8] sm:$0x3]  ;;  %v1883_v1 = vmov 0.0   ;;  %v1884_v2 = vmov 65535   ;;  %s1881_s18 = sphi %s1954_s18, %s332_s18  }
  0x12   : >> { %1712 = vmatprep.subr.bf16.mxu0 %v1883_v1  ;;  %1664 = vmatprep.subr.bf16.mxu1 %v1883_v1  ;;  %v358_v3 = vsel %vm356_vm0, 4294967295, %v1884_v2  ;;  %v351_v4 = vld [vmem:[%s2227_s3] sm:$0x3]  ;;  %vm1885_vm2 = vmmov 0   ;;  %s1974_s23 = sshll.u32 %s1881_s18, 4  ;;  %vm352_vm3 = vcmask 23552  }
  0x13   : >> { %v1967_v5 = vsel %vm357_vm1, %v358_v3, 0  ;;  %1666 = vmatprep.mubr.msk.bf16.mxu1 %vm1885_vm2, %v1883_v1  ;;  %1714 = vmatprep.mubr.msk.bf16.mxu0 %vm1885_vm2, %v1883_v1  ;;  %s1980_s24 = scalar_lea.vmem %s1942_s11, %s1974_s23  ;;  %s1986_s28 = scalar_lea.vmem %s2225_s1, %s1974_s23  ;;  %v1574_v8 = vld [vmem:[%s2228_s4 + $0x8] sm:$0x3]  ;;  %v410_v9 = vld [vmem:[%s2228_s4] sm:$0x3]  ;;  %vm1384_vm4 = vcmask 130048  }
  0x14   : >> { %v814_v6 = vand.u32 %v1570_v0, %v1967_v5  ;;  %v361_v7 = vand.u32 %v1967_v5, %v351_v4  ;;  %v343_v10 = vld [vmem:[%s1980_s24] sm:$0xff]  ;;  %v344_v11 = vld [vmem:[%s1980_s24 + $0x8] sm:$0x3f]  ;;  %v1566_v15 = vld [vmem:[%s1980_s24 + $0x11] sm:$0xff]  ;;  %v415_v22 = vand.u32 %v410_v9, %v1967_v5  ;;  %v868_v24 = vand.u32 %v1574_v8, %v1967_v5  ;;  %s2012_s12 = scalar_lea.vmem %s1947_s14, %s1974_s23  ;;  %s1429_s19 = scalar_lea.vmem %s1952_s17, %s1974_s23 }
  0x15   : >> { %v346_v12 = vld [vmem:[%s1986_s28] sm:$0xff]  ;;  %v347_v13 = vld [vmem:[%s1986_s28 + $0x8] sm:$0x3f]  ;;  %v1567_v16 = vld [vmem:[%s1980_s24 + $0x19] sm:$0x3f]  ;;  %vm1431_vm5 = vcmask 21504  }
  0x16   : >> { %1713 = vmatpush3.bf16.msra.mxu0 %v814_v6  ;;  %1665 = vmatpush3.bf16.msra.mxu1 %v361_v7  ;;  %v348_v14 = vmul.f32 %v346_v12, %v343_v10  ;;  %v349_v17 = vmul.f32 %v347_v13, %v344_v11  ;;  %v1568_v18 = vld [vmem:[%s1986_s28 + $0x11] sm:$0xff]  ;;  %v1569_v19 = vld [vmem:[%s1986_s28 + $0x19] sm:$0x3f]  ;;  %v407_v26 = vld [vmem:[%s2012_s12] sm:$0xff]  ;;  %s332_s18 = sadd.s32 1, %s1881_s18  }
  0x17   : >> { %1718 = vmatprep.subr.bf16.mxu0 %v1883_v1  ;;  %1670 = vmatprep.subr.bf16.mxu1 %v1883_v1  ;;  %v805_v20 = vmul.f32 %v1568_v18, %v1566_v15  ;;  %v806_v21 = vmul.f32 %v1569_v19, %v1567_v16  ;;  %v408_v27 = vld [vmem:[%s2012_s12 + $0x8] sm:$0x3f]  ;;  %v1572_v28 = vld [vmem:[%s2012_s12 + $0x11] sm:$0xff]  ;;  %v1573_v29 = vld [vmem:[%s2012_s12 + $0x19] sm:$0x3f]  ;;  %p329_p4 = scmp.ge.s32.totalorder %s332_s18, 14  }
  0x18   : >> { %v350_v23 = vpack.c.bf16 %v349_v17, %v348_v14  ;;  %v1545_v30 = vld [vmem:[%s2227_s3 + $0x2] sm:$0x3]  ;;  %v1580_v31 = vld [vmem:[%s2227_s3 + $0xa] sm:$0x3]  ;;  %v409_v32 = vpack.c.bf16 %v408_v27, %v407_v26  ;;  %v1554_v33 = vld [vmem:[%s1980_s24 + $0x10] sm:$0xff]  ;;  %v861_v35 = vpack.c.bf16 %v1573_v29, %v1572_v28 }
  0x19   : >> { %v807_v25 = vpack.c.bf16 %v806_v21, %v805_v20  ;;  %v1555_v34 = vld [vmem:[%s1980_s24 + $0x18] sm:$0x3f]  ;;  %v473_v36 = vand.u32 %v1545_v30, %v1967_v5  ;;  %v1557_v37 = vld [vmem:[%s1986_s28 + $0x10] sm:$0xff]  ;;  %v1599_v39 = vld [vmem:[%s1980_s24 + $0x21] sm:$0xff]  ;;  %v926_v40 = vand.u32 %v1580_v31, %v1967_v5 }
  0x1a   : >> { %1667 = vmatmul.mubr.msk.bf16.vlgmr.msra.gmra.mrb[0].mxu1 %vm352_vm3, %v350_v23  ;;  %v1558_v38 = vld [vmem:[%s1986_s28 + $0x18] sm:$0x3f]  ;;  %v2035_v41 = vmul.f32 %v1557_v37, %v1554_v33  ;;  %v1600_v43 = vld [vmem:[%s1980_s24 + $0x29] sm:$0x3f]  ;;  %v1601_v44 = vld [vmem:[%s1986_s28 + $0x21] sm:$0xff] }
  0x1b   : >> { %1715 = vmatmul.mubr.msk.bf16.vlgmr.msra.gmra.mrb[0].mxu0 %vm352_vm3, %v807_v25  ;;  %1671 = vmatpush3.bf16.msra.mxu1 %v415_v22  ;;  %v2037_v42 = vmul.f32 %v1558_v38, %v1555_v34  ;;  %v1602_v45 = vld [vmem:[%s1986_s28 + $0x29] sm:$0x3f]  ;;  %v460_v46 = vld [vmem:[%s1980_s24 + $0x1] sm:$0xff]  ;;  %v2045_v49 = vmul.f32 %v1601_v44, %v1599_v39  ;;  %v1576_v52 = vld [vmem:[%s1980_s24 + $0x12] sm:$0xff] }
  0x1c   : >> { %1719 = vmatpush3.bf16.msra.mxu0 %v868_v24  ;;  %1672 = vmatprep.mubr.msk.bf16.mxu1 %vm1885_vm2, %v1883_v1  ;;  %v461_v47 = vld [vmem:[%s1980_s24 + $0x9] sm:$0x3f]  ;;  %v462_v48 = vld [vmem:[%s1986_s28 + $0x1] sm:$0xff]  ;;  %v2047_v50 = vmul.f32 %v1602_v45, %v1600_v43  ;;  %v1577_v53 = vld [vmem:[%s1980_s24 + $0x1a] sm:$0x3f] }
  0x1d   : >> { %1720 = vmatprep.mubr.msk.bf16.mxu0 %vm1885_vm2, %v1883_v1  ;;  %1724 = vmatprep.subr.bf16.mxu0 %v1883_v1  ;;  %v463_v51 = vld [vmem:[%s1986_s28 + $0x9] sm:$0x3f]  ;;  %v694_v54 = vpack.c.bf16 %v2037_v42, %v2035_v41  ;;  %v1578_v55 = vld [vmem:[%s1986_s28 + $0x12] sm:$0xff]  ;;  %v1579_v59 = vld [vmem:[%s1986_s28 + $0x1a] sm:$0x3f]  ;;  %v464_v0 = vmul.f32 %v462_v48, %v460_v46 }
  0x1e   : >> { %1676 = vmatprep.subr.bf16.mxu1 %v1883_v1  ;;  %v1148_v56 = vpack.c.bf16 %v2047_v50, %v2045_v49  ;;  %v1609_v57 = vld [vmem:[%s1980_s24 + $0x22] sm:$0xff]  ;;  %v1610_v58 = vld [vmem:[%s1980_s24 + $0x2a] sm:$0x3f]  ;;  %v465_v2 = vmul.f32 %v463_v51, %v461_v47  ;;  %v917_v3 = vmul.f32 %v1578_v55, %v1576_v52  ;;  %v918_v4 = vmul.f32 %v1579_v59, %v1577_v53  ;;  %v1582_v15 = vld [vmem:[%s2012_s12 + $0x12] sm:$0xff] }
  0x1f   : >> { %v1611_v60 = vld [vmem:[%s1986_s28 + $0x22] sm:$0xff]  ;;  %v1612_v61 = vld [vmem:[%s1986_s28 + $0x2a] sm:$0x3f]  ;;  %v1583_v16 = vld [vmem:[%s2012_s12 + $0x1a] sm:$0x3f] }
  0x20   : >> { %v2069_v62 = vmul.f32 %v1611_v60, %v1609_v57  ;;  %v2071_v63 = vmul.f32 %v1612_v61, %v1610_v58  ;;  %v1547_v7 = vld [vmem:[%s2228_s4 + $0x2] sm:$0x3]  ;;  %v1584_v8 = vld [vmem:[%s2228_s4 + $0xa] sm:$0x3]  ;;  %v466_v9 = vpack.c.bf16 %v465_v2, %v464_v0  ;;  %v919_v10 = vpack.c.bf16 %v918_v4, %v917_v3  ;;  %v1549_v17 = vld [vmem:[%s2227_s3 + $0x4] sm:$0x3] }
  0x21   : >> { %v527_v11 = vand.u32 %v1547_v7, %v1967_v5  ;;  %v980_v12 = vand.u32 %v1584_v8, %v1967_v5  ;;  %v518_v13 = vld [vmem:[%s2012_s12 + $0x1] sm:$0xff]  ;;  %v519_v14 = vld [vmem:[%s2012_s12 + $0x9] sm:$0x3f]  ;;  %v973_v20 = vpack.c.bf16 %v1583_v16, %v1582_v15  ;;  %v585_v21 = vand.u32 %v1549_v17, %v1967_v5  ;;  %v1562_v41 = vld [vmem:[%s2012_s12 + $0x10] sm:$0xff] }
  0x22   : >> { %v1260_v6 = vpack.c.bf16 %v2071_v63, %v2069_v62  ;;  %v1592_v18 = vld [vmem:[%s2227_s3 + $0xc] sm:$0x3]  ;;  %v520_v19 = vpack.c.bf16 %v519_v14, %v518_v13  ;;  %v572_v23 = vld [vmem:[%s1980_s24 + $0x2] sm:$0xff]  ;;  %v1603_v48 = vld [vmem:[%s2227_s3 + $0xe] sm:$0x3] }
  0x23   : >> { %v1042_v22 = vand.u32 %v1592_v18, %v1967_v5  ;;  %v573_v24 = vld [vmem:[%s1980_s24 + $0xa] sm:$0x3f]  ;;  %v574_v25 = vld [vmem:[%s1986_s28 + $0x2] sm:$0xff]  ;;  %v1155_v55 = vand.u32 %v1603_v48, %v1967_v5  ;;  %v1563_v42 = vld [vmem:[%s2012_s12 + $0x18] sm:$0x3f] }
  0x24   : >> { %v575_v26 = vld [vmem:[%s1986_s28 + $0xa] sm:$0x3f]  ;;  %v1587_v27 = vld [vmem:[%s1980_s24 + $0x20] sm:$0xff]  ;;  %v576_v31 = vmul.f32 %v574_v25, %v572_v23  ;;  %v1613_v49 = vld [vmem:[%s2227_s3 + $0x10] sm:$0x3]  ;;  %v749_v50 = vpack.c.bf16 %v1563_v42, %v1562_v41 }
  0x25   : >> { %v1588_v28 = vld [vmem:[%s1980_s24 + $0x28] sm:$0x3f]  ;;  %v1590_v29 = vld [vmem:[%s1986_s28 + $0x20] sm:$0xff]  ;;  %v1607_v58 = vld [vmem:[%s2228_s4 + $0xe] sm:$0x3]  ;;  %v1267_v0 = vand.u32 %v1613_v49, %v1967_v5 }
  0x26   : >> { %1673 = vmatmul.mubr.msk.bf16.vlgmr.msra.gmra.mrb[0].mxu1 %vm352_vm3, %v409_v32  ;;  %v1591_v30 = vld [vmem:[%s1986_s28 + $0x28] sm:$0x3f]  ;;  %v577_v32 = vmul.f32 %v575_v26, %v573_v24  ;;  %v1033_v33 = vmul.f32 %v1590_v29, %v1587_v27  ;;  %v1595_v45 = vld [vmem:[%s2012_s12 + $0x20] sm:$0xff]  ;;  %v1209_v60 = vand.u32 %v1607_v58, %v1967_v5  ;;  %v1617_v2 = vld [vmem:[%s2228_s4 + $0x10] sm:$0x3] }
  0x27   : >> { %1721 = vmatmul.mubr.msk.bf16.vlgmr.msra.gmra.mrb[0].mxu0 %vm352_vm3, %v861_v35  ;;  %1677 = vmatpush3.bf16.msra.mxu1 %v473_v36  ;;  %v1034_v34 = vmul.f32 %v1591_v30, %v1588_v28  ;;  %v1551_v35 = vld [vmem:[%s2228_s4 + $0x4] sm:$0x3]  ;;  %v1597_v36 = vld [vmem:[%s2228_s4 + $0xc] sm:$0x3]  ;;  %v1559_v47 = vld [vmem:[%s2227_s3 + $0x6] sm:$0x3]  ;;  %v1321_v3 = vand.u32 %v1617_v2, %v1967_v5 }
  0x28   : >> { %1725 = vmatpush3.bf16.msra.mxu0 %v926_v40  ;;  %1678 = vmatprep.mubr.msk.bf16.mxu1 %vm1885_vm2, %v1883_v1  ;;  %v578_v37 = vpack.c.bf16 %v577_v32, %v576_v31  ;;  %v639_v39 = vand.u32 %v1551_v35, %v1967_v5  ;;  %v1097_v40 = vand.u32 %v1597_v36, %v1967_v5  ;;  %v630_v43 = vld [vmem:[%s2012_s12 + $0x2] sm:$0xff]  ;;  %v631_v44 = vld [vmem:[%s2012_s12 + $0xa] sm:$0x3f]  ;;  %v1541_v63 = vld [vmem:[%s2229_s5] ss:$0 sm:$0xff] }
  0x29   : >> { %1726 = vmatprep.mubr.msk.bf16.mxu0 %vm1885_vm2, %v1883_v1  ;;  %1730 = vmatprep.subr.bf16.mxu0 %v1883_v1  ;;  %v1035_v38 = vpack.c.bf16 %v1034_v34, %v1033_v33  ;;  %v1596_v46 = vld [vmem:[%s2012_s12 + $0x28] sm:$0x3f]  ;;  %v632_v51 = vpack.c.bf16 %v631_v44, %v630_v43  ;;  %v701_v53 = vand.u32 %v1559_v47, %v1967_v5  ;;  %v1564_v57 = vld [vmem:[%s2228_s4 + $0x6] sm:$0x3] }
  0x2a   : >> { %1682 = vmatprep.subr.bf16.mxu1 %v1883_v1  ;;  %v1090_v52 = vpack.c.bf16 %v1596_v46, %v1595_v45  ;;  %v756_v59 = vand.u32 %v1564_v57, %v1967_v5  ;;  %v1606_v61 = vld [vmem:[%s2012_s12 + $0x29] sm:$0x3f] }
  0x2b   : >> { %v1615_v4 = vld [vmem:[%s2012_s12 + $0x22] sm:$0xff]  ;;  %v1616_v7 = vld [vmem:[%s2012_s12 + $0x2a] sm:$0x3f] }
  0x2c   : >> { %v1314_v8 = vpack.c.bf16 %v1616_v7, %v1615_v4 }
  0x32   : >> { %1679 = vmatmul.mubr.msk.bf16.vlgmr.msra.gmra.mrb[0].mxu1 %vm352_vm3, %v466_v9  ;;  %v1866_v9 = vld [vmem:[%s2230_s6] sm:$0xff]  }
  0x33   : >> { %1727 = vmatmul.mubr.msk.bf16.vlgmr.msra.gmra.mrb[0].mxu0 %vm352_vm3, %v919_v10  ;;  %1683 = vmatpush3.bf16.msra.mxu1 %v527_v11 }
  0x34   : >> { %1731 = vmatpush3.bf16.msra.mxu0 %v980_v12  ;;  %1684 = vmatprep.mubr.msk.bf16.mxu1 %vm1885_vm2, %v1883_v1 }
  0x35   : >> { %1732 = vmatprep.mubr.msk.bf16.mxu0 %vm1885_vm2, %v1883_v1  ;;  %1736 = vmatprep.subr.bf16.mxu0 %v1883_v1 }
  0x36   : >> { %1688 = vmatprep.subr.bf16.mxu1 %v1883_v1 }
  0x3e   : >> { %1685 = vmatmul.mubr.msk.bf16.vlgmr.msra.gmra.mrb[0].mxu1 %vm352_vm3, %v520_v19 }
  0x3f   : >> { %1733 = vmatmul.mubr.msk.bf16.vlgmr.msra.gmra.mrb[0].mxu0 %vm352_vm3, %v973_v20  ;;  %1689 = vmatpush3.bf16.msra.mxu1 %v585_v21  ;;  %v1619_v21 = vld [vmem:[%s2231_s7] ss:$0 sm:$0xff] }
  0x40   : >> { %1737 = vmatpush3.bf16.msra.mxu0 %v1042_v22  ;;  %1690 = vmatprep.mubr.msk.bf16.mxu1 %vm1885_vm2, %v1883_v1 }
  0x41   : >> { %1738 = vmatprep.mubr.msk.bf16.mxu0 %vm1885_vm2, %v1883_v1  ;;  %1742 = vmatprep.subr.bf16.mxu0 %v1883_v1 }
  0x42   : >> { %1694 = vmatprep.subr.bf16.mxu1 %v1883_v1 }
  0x4a   : >> { %1691 = vmatmul.mubr.msk.bf16.vlgmr.msra.gmra.mrb[0].mxu1 %vm352_vm3, %v578_v37 }
  0x4b   : >> { %1739 = vmatmul.mubr.msk.bf16.vlgmr.msra.gmra.mrb[0].mxu0 %vm352_vm3, %v1035_v38  ;;  %1695 = vmatpush3.bf16.msra.mxu1 %v639_v39 }
  0x4c   : >> { %1743 = vmatpush3.bf16.msra.mxu0 %v1097_v40  ;;  %1696 = vmatprep.mubr.msk.bf16.mxu1 %vm1885_vm2, %v1883_v1 }
  0x4d   : >> { %1744 = vmatprep.mubr.msk.bf16.mxu0 %vm1885_vm2, %v1883_v1  ;;  %1748 = vmatprep.subr.bf16.mxu0 %v1883_v1 }
  0x4e   : >> { %1700 = vmatprep.subr.bf16.mxu1 %v1883_v1 }
  0x56   : >> { %1697 = vmatmul.mubr.msk.bf16.vlgmr.msra.gmra.mrb[0].mxu1 %vm352_vm3, %v632_v51 }
  0x57   : >> { %1745 = vmatmul.mubr.msk.bf16.vlgmr.msra.gmra.mrb[0].mxu0 %vm352_vm3, %v1090_v52  ;;  %1701 = vmatpush3.bf16.msra.mxu1 %v701_v53 }
  0x58   : >> { %1749 = vmatpush3.bf16.msra.mxu0 %v1155_v55  ;;  %1702 = vmatprep.mubr.msk.bf16.mxu1 %vm1885_vm2, %v1883_v1 }
  0x59   : >> { %1750 = vmatprep.mubr.msk.bf16.mxu0 %vm1885_vm2, %v1883_v1  ;;  %1754 = vmatprep.subr.bf16.mxu0 %v1883_v1 }
  0x5a   : >> { %1706 = vmatprep.subr.bf16.mxu1 %v1883_v1 }
  0x62   : >> { %1703 = vmatmul.mubr.msk.bf16.vlgmr.msra.gmra.mrb[0].mxu1 %vm352_vm3, %v694_v54  ;;  %v1605_v54 = vld [vmem:[%s2012_s12 + $0x21] sm:$0xff] }
  0x63   : >> { %1751 = vmatmul.mubr.msk.bf16.vlgmr.msra.gmra.mrb[0].mxu0 %vm352_vm3, %v1148_v56  ;;  %1707 = vmatpush3.bf16.msra.mxu1 %v756_v59  ;;  %v1202_v56 = vpack.c.bf16 %v1606_v61, %v1605_v54 }
  0x64   : >> { %1755 = vmatpush3.bf16.msra.mxu0 %v1209_v60  ;;  %1708 = vmatprep.mubr.msk.bf16.mxu1 %vm1885_vm2, %v1883_v1 }
  0x65   : >> { %1756 = vmatprep.mubr.msk.bf16.mxu0 %vm1885_vm2, %v1883_v1  ;;  %1760 = vmatprep.subr.bf16.mxu0 %v1883_v1 }
  0x66   : >> { %1772 = vmatprep.subr.bf16.mxu1 %v1883_v1 }
  0x6e   : >> { %1709 = vmatmul.mubr.msk.bf16.vlgmr.msra.gmra.mrb[0].mxu1 %vm352_vm3, %v749_v50 }
  0x6f   : >> { %1757 = vmatmul.mubr.msk.bf16.vlgmr.msra.gmra.mrb[0].mxu0 %vm352_vm3, %v1202_v56  ;;  %1774 = vmatprep.mubr.msk.bf16.mxu1 %vm1885_vm2, %v1883_v1 }
  0x70   : >> { %1761 = vmatpush3.bf16.msra.mxu0 %v1267_v0  ;;  %1762 = vmatprep.mubr.msk.bf16.mxu0 %vm1885_vm2, %v1883_v1 }
  0x71   : >> { %1766 = vmatprep.subr.bf16.mxu0 %v1883_v1  ;;  %1773 = vmatpush3.bf16.msra.mxu1 %v1866_v9 }
  0x7b   : >> { %1763 = vmatmul.mubr.msk.bf16.vlgmr.msra.gmra.mrb[0].mxu0 %vm352_vm3, %v1260_v6 }
  0x7c   : >> { %1767 = vmatpush3.bf16.msra.mxu0 %v1321_v3  ;;  %1768 = vmatprep.mubr.msk.bf16.mxu0 %vm1885_vm2, %v1883_v1 }
  0x87   : >> { %1769 = vmatmul.mubr.msk.bf16.vlgmr.msra.gmra.mrb[0].mxu0 %vm352_vm3, %v1314_v8 }
 0x141   : >> { %v792_v5 = vpop.f32.mrb[0].mxu1 }
 0x142   : >> { %v1710_v10 = vpop.f32.mrb[1].mxu1  ;;  %v1778_v1 = vadd.f32 %v1541_v63, %v792_v5 }
 0x143   : >> { %v795_v11 = vpop.f32.mrb[2].mxu1 }
 0x144   : >> { %v1711_v62 = vpop.f32.mrb[3].mxu1  ;;  %v1780_v12 = vadd.f32 %v1541_v63, %v795_v11 }
 0x15a   : >> { %v1357_v6 = vpop.f32.mrb[0].mxu0 }
 0x15b   : >> { %v1779_v13 = vadd.f32 %v1778_v1, %v1357_v6  ;;  %v1770_v14 = vpop.f32.mrb[1].mxu0 }
 0x15c   : >> { %v1360_v15 = vpop.f32.mrb[2].mxu0 }
 0x15d   : >> { %v1781_v16 = vadd.f32 %v1780_v12, %v1360_v15  ;;  %v1771_v17 = vpop.f32.mrb[3].mxu0  ;;  %v1366_v18 = vmax.f32 %v1779_v13, 0.0 }
 0x15f   : >> { %v1367_v19 = vmax.f32 %v1781_v16, 0.0 }
 0x161   : >> { %v1368_v20 = vpack.c.bf16 %v1367_v19, %v1366_v18 }
 0x163   : >> { %1775 = vmatmul.mubr.msk.bf16.vlgmr.msra.gmra.mrb[4].mxu1 %vm1384_vm4, %v1368_v20 }
 0x235   : > { %331 = sbr.rel (!%p329_p4) target bundleno = 17 (0x11), region = 118 }
 0x236   : >> { %v1422_v22 = vpop.f32.mrb[4].mxu1 }
 0x237   : >> { %v1423_v23 = vadd.f32 %v1619_v21, %v1422_v22  ;;  %v1776_v24 = vpop.f32.mrb[5].mxu1 }
 0x238   : >> { %v1425_v25 = vpop.f32.mrb[6].mxu1 }
 0x239   : >> { %1430 = vst.msk [vmem:[%s1429_s19] sm:$0xff] %vm352_vm3, %v1423_v23  ;;  %v1426_v26 = vadd.f32 %v1619_v21, %v1425_v25  ;;  %v1777_v27 = vpop.f32.mrb[7].mxu1 }
 0x23b   : >> { %1432 = vst.msk [vmem:[%s1429_s19 + $0x8] sm:$0x3f] %vm1431_vm5, %v1426_v26 }
 0x23c PF: > { %s18_s27 = sadd.s32 1, %s1877_s27  }
 0x23d   : > { %p15_p5 = scmp.ge.s32.totalorder %s18_s27, 4  }
 0x23f   :  { %17 = sbr.rel (!%p15_p5) target bundleno = 1 (0x1), region = 129 }

</bundles_post_ra>
